<compile_context>
chip_gen: v7x
topology: tpu7x:2x2x1
jax: 0.10.0
libtpu: 0.0.40
codegen_flags: <defaults>
</compile_context>

<pallas_src>
import numpy as np
import jax
import jax.numpy as jnp
from jax import lax
from jax.experimental import pallas as pl
from jax.experimental.pallas import tpu as pltpu

# Model hyper-parameters (from the PyTorch module)
BATCH_SIZE = 1
EMBEDDING_SIZE = 10
HIDDEN_SIZE = 8
INPUT_SIZE = 4          # vocabulary size of the Embedding
NUM_CLASS = 4
NUM_LAYERS = 2
SEQ_LEN = 8             # sequence length for the example input

# ---- packed-weight slab layout (all rows 8-aligned, gates 128-lane aligned) ----
GS = 128                       # lane stride per gate block (r, z, n)
SLAB_COLS = 3 * GS             # 384
ROW_TBL0 = 0                   # rows 0:8  (4 real): emb @ Wih0 per gate, biases folded (token table)
ROW_WHH0 = 8                   # rows 8:16 : layer-0 hidden weights per gate (pre-transposed)
ROW_WIH1 = 16                  # rows 16:24: layer-1 input  weights per gate
ROW_WHH1 = 24                  # rows 24:32: layer-1 hidden weights per gate
ROW_BIAS = 32                  # rows 32:40 (6 real): bhh0_n, b1_r, b1_z, bih1_n, bhh1_n, b_fc
ROW_WFC = 40                   # rows 40:48: fc weight (H,C) in lanes 0:C
SLAB_ROWS = 48


def gru_fc_kernel(idx_ref, slab_ref, out_ref, g0_ref, h1seq_ref):
    """Embedding + 2-layer GRU (h0 = zeros) + Linear + ReLU, fully unrolled & layer-interleaved.

    idx_ref   : (T, 1) int32 token indices
    slab_ref  : (48, 384) f32 packed weights/biases (see layout constants above)
    out_ref   : (T, C)
    g0_ref    : (T, 3*GS) scratch: layer-0 input-gate projections (biases folded)
    h1seq_ref : (T, H)    scratch: layer-1 hidden sequence for the final fc matmul
    """
    T = idx_ref.shape[0]
    H = HIDDEN_SIZE
    C = NUM_CLASS

    # ---- one-shot prologue: embedding gather folded into layer-0 input projection ----
    # one-hot (T,8) @ token-table (8, 3*GS); table rows 4:8 are zero padding.
    idx = idx_ref[...]                                        # (T, 1) int32
    iota = lax.broadcasted_iota(jnp.int32, (T, 8), 1)         # (T, 8)
    onehot = (iota == idx).astype(jnp.float32)                # (T, 8)
    tbl0 = slab_ref[pl.ds(ROW_TBL0, 8), :]                    # (8, 3*GS)
    g0_ref[...] = jnp.dot(onehot, tbl0, preferred_element_type=jnp.float32)

    # ---- load small resident weights/biases once (single-slab carve, static slices) ----
    whh0 = slab_ref[pl.ds(ROW_WHH0, 8), :]                    # (8, 3*GS)
    wih1 = slab_ref[pl.ds(ROW_WIH1, 8), :]
    whh1 = slab_ref[pl.ds(ROW_WHH1, 8), :]
    bhh0_n = slab_ref[pl.ds(ROW_BIAS + 0, 1), pl.ds(0, H)]    # (1, H)
    b1_r   = slab_ref[pl.ds(ROW_BIAS + 1, 1), pl.ds(0, H)]
    b1_z   = slab_ref[pl.ds(ROW_BIAS + 2, 1), pl.ds(0, H)]
    bih1_n = slab_ref[pl.ds(ROW_BIAS + 3, 1), pl.ds(0, H)]
    bhh1_n = slab_ref[pl.ds(ROW_BIAS + 4, 1), pl.ds(0, H)]

    h0 = jnp.zeros((1, H), jnp.float32)
    h1 = jnp.zeros((1, H), jnp.float32)

    # ---- fully unrolled, interleaved 2-layer recurrence (T is a compile-time constant) ----
    for t in range(T):
        # layer-1 hidden projection depends only on h1_{t-1}; off the critical path,
        # the LLO scheduler overlaps it with the layer-0 work of this step.
        gh1 = jnp.dot(h1, whh1, preferred_element_type=jnp.float32)   # (1, 3*GS)

        # layer 0, step t  (gate order r, z, n; PyTorch GRU semantics)
        gh0 = jnp.dot(h0, whh0, preferred_element_type=jnp.float32)   # (1, 3*GS)
        g0_t = g0_ref[pl.ds(t, 1), :]                                  # (1, 3*GS), biases folded
        r0 = jax.nn.sigmoid(g0_t[:, 0:H] + gh0[:, 0:H])
        z0 = jax.nn.sigmoid(g0_t[:, GS:GS + H] + gh0[:, GS:GS + H])
        n0 = jnp.tanh(g0_t[:, 2 * GS:2 * GS + H]
                      + r0 * (gh0[:, 2 * GS:2 * GS + H] + bhh0_n))
        h0 = (1.0 - z0) * n0 + z0 * h0

        # layer 1, step t  (input h0[t] straight from registers, no VMEM round trip)
        gi1 = jnp.dot(h0, wih1, preferred_element_type=jnp.float32)   # (1, 3*GS)
        r1 = jax.nn.sigmoid(gi1[:, 0:H] + gh1[:, 0:H] + b1_r)
        z1 = jax.nn.sigmoid(gi1[:, GS:GS + H] + gh1[:, GS:GS + H] + b1_z)
        n1 = jnp.tanh(gi1[:, 2 * GS:2 * GS + H] + bih1_n
                      + r1 * (gh1[:, 2 * GS:2 * GS + H] + bhh1_n))
        h1 = (1.0 - z1) * n1 + z1 * h1

        h1seq_ref[pl.ds(t, 1), :] = h1

    # ---- fc + relu (single one-shot matmul, single store) ----
    wfc = slab_ref[pl.ds(ROW_WFC, 8), pl.ds(0, C)]             # (H, C)
    bfc = slab_ref[pl.ds(ROW_BIAS + 5, 1), pl.ds(0, C)]        # (1, C)
    logits = jnp.dot(h1seq_ref[...], wfc, preferred_element_type=jnp.float32) + bfc
    out_ref[...] = jnp.maximum(logits, 0.0)


def prepare_params(params):
    """One-time host-side repack of raw (PyTorch-layout) params into ONE kernel-ready slab.

    All transposes / gate splits / bias folds / the embedding @ W_ih0 fold happen here.
    """
    H, C, V = HIDDEN_SIZE, NUM_CLASS, INPUT_SIZE
    f32 = np.float32
    emb = np.asarray(params["emb"], f32)
    w_ih0 = np.asarray(params["w_ih0"], f32); w_hh0 = np.asarray(params["w_hh0"], f32)
    b_ih0 = np.asarray(params["b_ih0"], f32); b_hh0 = np.asarray(params["b_hh0"], f32)
    w_ih1 = np.asarray(params["w_ih1"], f32); w_hh1 = np.asarray(params["w_hh1"], f32)
    b_ih1 = np.asarray(params["b_ih1"], f32); b_hh1 = np.asarray(params["b_hh1"], f32)
    w_fc = np.asarray(params["w_fc"], f32);   b_fc = np.asarray(params["b_fc"], f32)

    def gate(w, g):   # torch (3H, K) layout, gate order r,z,n -> (K, H) pre-transposed
        return w[g * H:(g + 1) * H, :].T

    slab = np.zeros((SLAB_ROWS, SLAB_COLS), f32)

    # layer-0 token table: embedding row @ Wih0_g^T + folded biases (b_ih+b_hh for r,z; b_ih for n)
    for g in range(3):
        proj = emb @ gate(w_ih0, g)                                          # (V, H)
        bias = b_ih0[g * H:(g + 1) * H] + (b_hh0[g * H:(g + 1) * H] if g < 2 else 0.0)
        slab[ROW_TBL0:ROW_TBL0 + V, g * GS:g * GS + H] = proj + bias

    # per-gate recurrence weights, 128-lane-aligned per gate block
    for g in range(3):
        slab[ROW_WHH0:ROW_WHH0 + H, g * GS:g * GS + H] = gate(w_hh0, g)
        slab[ROW_WIH1:ROW_WIH1 + H, g * GS:g * GS + H] = gate(w_ih1, g)
        slab[ROW_WHH1:ROW_WHH1 + H, g * GS:g * GS + H] = gate(w_hh1, g)

    # biases that must stay in the per-step body
    slab[ROW_BIAS + 0, 0:H] = b_hh0[2 * H:3 * H]                  # b_hh0_n (inside r0 * (.))
    slab[ROW_BIAS + 1, 0:H] = b_ih1[0:H] + b_hh1[0:H]             # layer-1 r bias
    slab[ROW_BIAS + 2, 0:H] = b_ih1[H:2 * H] + b_hh1[H:2 * H]     # layer-1 z bias
    slab[ROW_BIAS + 3, 0:H] = b_ih1[2 * H:3 * H]                  # b_ih1_n
    slab[ROW_BIAS + 4, 0:H] = b_hh1[2 * H:3 * H]                  # b_hh1_n (inside r1 * (.))
    slab[ROW_BIAS + 5, 0:C] = b_fc

    # fc weight (pre-transposed)
    slab[ROW_WFC:ROW_WFC + H, 0:C] = w_fc.T

    return jnp.asarray(slab)


def model_forward(x_idx, slab):
    """x_idx: (BATCH_SIZE, T) int32 token indices. Returns (BATCH_SIZE*T, NUM_CLASS)."""
    assert x_idx.shape[0] == 1, "layer-interleaved recurrence folds batch*seq; valid only for batch=1"
    T = x_idx.shape[0] * x_idx.shape[1]
    H, C = HIDDEN_SIZE, NUM_CLASS

    idx = x_idx.reshape(T, 1).astype(jnp.int32)   # gather itself happens inside the kernel

    vmem = pl.BlockSpec(memory_space=pltpu.MemorySpace.VMEM)
    out = pl.pallas_call(
        gru_fc_kernel,
        out_shape=jax.ShapeDtypeStruct((T, C), jnp.float32),
        in_specs=[vmem, vmem],
        out_specs=vmem,
        scratch_shapes=[
            pltpu.VMEM((T, SLAB_COLS), jnp.float32),   # layer-0 input-gate projections (per gate block)
            pltpu.VMEM((T, H), jnp.float32),           # layer-1 hidden sequence
        ],
    )(idx, slab)
    return out                                         # (B*T, NUM_CLASS)


def init_params(key):
    """Deterministic parameter init matching the PyTorch module's shapes (raw torch layout)."""
    H, E, C, V = HIDDEN_SIZE, EMBEDDING_SIZE, NUM_CLASS, INPUT_SIZE
    ks = jax.random.split(key, 12)
    k = 1.0 / np.sqrt(H)
    u = lambda kk, shape: jax.random.uniform(kk, shape, jnp.float32, -k, k)
    return {
        "emb":   jax.random.normal(ks[0], (V, E), jnp.float32),   # Embedding: N(0, 1)
        "w_ih0": u(ks[1], (3 * H, E)),
        "w_hh0": u(ks[2], (3 * H, H)),
        "b_ih0": u(ks[3], (3 * H,)),
        "b_hh0": u(ks[4], (3 * H,)),
        "w_ih1": u(ks[5], (3 * H, H)),
        "w_hh1": u(ks[6], (3 * H, H)),
        "b_ih1": u(ks[7], (3 * H,)),
        "b_hh1": u(ks[8], (3 * H,)),
        "w_fc":  u(ks[9], (C, H)),
        "b_fc":  u(ks[10], (C,)),
    }


def reference_forward(x_idx, params):
    """Pure-JAX reference replicating torch semantics (for correctness check)."""
    H = HIDDEN_SIZE
    with jax.default_matmul_precision("highest"):
        x = params["emb"][x_idx.reshape(-1)]                     # (T, E)

        def run_layer(seq, w_ih, w_hh, b_ih, b_hh):
            def step(h, x_t):
                gi = x_t @ w_ih.T + b_ih
                gh = h @ w_hh.T + b_hh
                r = jax.nn.sigmoid(gi[0:H] + gh[0:H])
                z = jax.nn.sigmoid(gi[H:2 * H] + gh[H:2 * H])
                n = jnp.tanh(gi[2 * H:] + r * gh[2 * H:])
                h_new = (1.0 - z) * n + z * h
                return h_new, h_new
            _, hs = lax.scan(step, jnp.zeros((H,), jnp.float32), seq)
            return hs

        h0_seq = run_layer(x, params["w_ih0"], params["w_hh0"], params["b_ih0"], params["b_hh0"])
        h1_seq = run_layer(h0_seq, params["w_ih1"], params["w_hh1"], params["b_ih1"], params["b_hh1"])
        out = jnp.maximum(h1_seq @ params["w_fc"].T + params["b_fc"], 0.0)
    return out.reshape(-1, NUM_CLASS)


if __name__ == "__main__":
    key = jax.random.PRNGKey(0)
    pkey, xkey = jax.random.split(key)
    params = init_params(pkey)

    # One-time weight repack into a single VMEM slab (hoisted out of the forward pass).
    slab = jax.block_until_ready(prepare_params(params))

    # Example input: (batch_size=1, seq_len=8) token indices in [0, INPUT_SIZE)
    x_idx = jax.random.randint(xkey, (BATCH_SIZE, SEQ_LEN), 0, INPUT_SIZE, dtype=jnp.int32)

    fwd = jax.jit(model_forward)
    out = jax.block_until_ready(fwd(x_idx, slab))

    ref = jax.block_until_ready(reference_forward(x_idx, params))
    np.testing.assert_allclose(np.asarray(out), np.asarray(ref), rtol=1e-5, atol=1e-5)
    assert out.shape == (BATCH_SIZE * SEQ_LEN, NUM_CLASS)

    print("KERNEL_OK")
</pallas_src>

<mosaic_0001>
module attributes {stable_mosaic.version = 11 : i64} {
  func.func @gru_fc_kernel(%arg0: memref<8x1xi32, #tpu.memory_space<vmem>>, %arg1: memref<48x384xf32, #tpu.memory_space<vmem>>, %arg2: memref<8x4xf32, #tpu.memory_space<vmem>>, %arg3: memref<8x384xf32, #tpu.memory_space<vmem>>, %arg4: memref<8x8xf32, #tpu.memory_space<vmem>>) attributes {dimension_semantics = [], scalar_prefetch = 0 : i64, scratch_operands = 2 : i64, tpu.core_type = #tpu.core_type<tc>} {
    %c0 = arith.constant 0 : index
    %c0_0 = arith.constant 0 : index
    %0 = vector.load %arg0[%c0, %c0_0] : memref<8x1xi32, #tpu.memory_space<vmem>>, vector<8x1xi32>
    %1 = tpu.iota {dimensions = array<i32: 1>} : vector<8x8xi32>
    %2 = vector.broadcast %0 : vector<8x1xi32> to vector<8x8xi32>
    %3 = arith.cmpi eq, %1, %2 : vector<8x8xi32>
    %4 = arith.extui %3 : vector<8x8xi1> to vector<8x8xi32>
    %5 = arith.sitofp %4 : vector<8x8xi32> to vector<8x8xf32>
    %c0_1 = arith.constant 0 : index
    %c0_2 = arith.constant 0 : index
    %6 = vector.load %arg1[%c0_1, %c0_2] : memref<48x384xf32, #tpu.memory_space<vmem>>, vector<8x384xf32>
    %cst = arith.constant dense<0.000000e+00> : vector<8x384xf32>
    %7 = tpu.matmul %5, %6, %cst {dimension_numbers = #tpu.dot_dimension_numbers<[1], [0], [0], [1], [0, 0, 1, 1], [], []>} : vector<8x8xf32>, vector<8x384xf32>, vector<8x384xf32> -> vector<8x384xf32>
    %c0_3 = arith.constant 0 : index
    %c0_4 = arith.constant 0 : index
    %8 = vector.load %arg3[%c0_3, %c0_4] : memref<8x384xf32, #tpu.memory_space<vmem>>, vector<8x384xf32>
    tpu.vector_store %arg3[%c0_3, %c0_4], %7 {strides = array<i32>} : memref<8x384xf32, #tpu.memory_space<vmem>>, vector<8x384xf32>,
    %c8 = arith.constant 8 : index
    %c0_5 = arith.constant 0 : index
    %9 = vector.load %arg1[%c8, %c0_5] : memref<48x384xf32, #tpu.memory_space<vmem>>, vector<8x384xf32>
    %c16 = arith.constant 16 : index
    %c0_6 = arith.constant 0 : index
    %10 = vector.load %arg1[%c16, %c0_6] : memref<48x384xf32, #tpu.memory_space<vmem>>, vector<8x384xf32>
    %c24 = arith.constant 24 : index
    %c0_7 = arith.constant 0 : index
    %11 = vector.load %arg1[%c24, %c0_7] : memref<48x384xf32, #tpu.memory_space<vmem>>, vector<8x384xf32>
    %c32 = arith.constant 32 : index
    %c0_8 = arith.constant 0 : index
    %12 = vector.load %arg1[%c32, %c0_8] : memref<48x384xf32, #tpu.memory_space<vmem>>, vector<1x8xf32>
    %c33 = arith.constant 33 : index
    %c0_9 = arith.constant 0 : index
    %13 = vector.load %arg1[%c33, %c0_9] : memref<48x384xf32, #tpu.memory_space<vmem>>, vector<1x8xf32>
    %c34 = arith.constant 34 : index
    %c0_10 = arith.constant 0 : index
    %14 = vector.load %arg1[%c34, %c0_10] : memref<48x384xf32, #tpu.memory_space<vmem>>, vector<1x8xf32>
    %c35 = arith.constant 35 : index
    %c0_11 = arith.constant 0 : index
    %15 = vector.load %arg1[%c35, %c0_11] : memref<48x384xf32, #tpu.memory_space<vmem>>, vector<1x8xf32>
    %c36 = arith.constant 36 : index
    %c0_12 = arith.constant 0 : index
    %16 = vector.load %arg1[%c36, %c0_12] : memref<48x384xf32, #tpu.memory_space<vmem>>, vector<1x8xf32>
    %cst_13 = arith.constant 0.000000e+00 : f32
    %17 = vector.broadcast %cst_13 : f32 to vector<1x8xf32>
    %cst_14 = arith.constant 0.000000e+00 : f32
    %18 = vector.broadcast %cst_14 : f32 to vector<1x8xf32>
    %cst_15 = arith.constant dense<0.000000e+00> : vector<1x384xf32>
    %19 = tpu.matmul %18, %11, %cst_15 {dimension_numbers = #tpu.dot_dimension_numbers<[1], [0], [0], [1], [0, 0, 1, 1], [], []>} : vector<1x8xf32>, vector<8x384xf32>, vector<1x384xf32> -> vector<1x384xf32>
    %cst_16 = arith.constant dense<0.000000e+00> : vector<1x384xf32>
    %20 = tpu.matmul %17, %9, %cst_16 {dimension_numbers = #tpu.dot_dimension_numbers<[1], [0], [0], [1], [0, 0, 1, 1], [], []>} : vector<1x8xf32>, vector<8x384xf32>, vector<1x384xf32> -> vector<1x384xf32>
    %c0_17 = arith.constant 0 : index
    %c0_18 = arith.constant 0 : index
    %21 = vector.load %arg3[%c0_17, %c0_18] : memref<8x384xf32, #tpu.memory_space<vmem>>, vector<1x384xf32>
    %22 = vector.extract_strided_slice %21 {offsets = [0, 0], sizes = [1, 8], strides = [1, 1]} : vector<1x384xf32> to vector<1x8xf32>
    %23 = vector.extract_strided_slice %20 {offsets = [0, 0], sizes = [1, 8], strides = [1, 1]} : vector<1x384xf32> to vector<1x8xf32>
    %24 = arith.addf %22, %23 : vector<1x8xf32>
    %25 = arith.negf %24 : vector<1x8xf32>
    %26 = math.exp %25 : vector<1x8xf32>
    %cst_19 = arith.constant 1.000000e+00 : f32
    %27 = vector.broadcast %cst_19 : f32 to vector<1x8xf32>
    %28 = arith.addf %27, %26 : vector<1x8xf32>
    %29 = arith.divf %27, %28 : vector<1x8xf32>
    %30 = vector.extract_strided_slice %21 {offsets = [0, 128], sizes = [1, 8], strides = [1, 1]} : vector<1x384xf32> to vector<1x8xf32>
    %31 = vector.extract_strided_slice %20 {offsets = [0, 128], sizes = [1, 8], strides = [1, 1]} : vector<1x384xf32> to vector<1x8xf32>
    %32 = arith.addf %30, %31 : vector<1x8xf32>
    %33 = arith.negf %32 : vector<1x8xf32>
    %34 = math.exp %33 : vector<1x8xf32>
    %cst_20 = arith.constant 1.000000e+00 : f32
    %35 = vector.broadcast %cst_20 : f32 to vector<1x8xf32>
    %36 = arith.addf %35, %34 : vector<1x8xf32>
    %37 = arith.divf %35, %36 : vector<1x8xf32>
    %38 = vector.extract_strided_slice %21 {offsets = [0, 256], sizes = [1, 8], strides = [1, 1]} : vector<1x384xf32> to vector<1x8xf32>
    %39 = vector.extract_strided_slice %20 {offsets = [0, 256], sizes = [1, 8], strides = [1, 1]} : vector<1x384xf32> to vector<1x8xf32>
    %40 = arith.addf %39, %12 : vector<1x8xf32>
    %41 = arith.mulf %29, %40 : vector<1x8xf32>
    %42 = arith.addf %38, %41 : vector<1x8xf32>
    %43 = math.tanh %42 : vector<1x8xf32>
    %cst_21 = arith.constant 1.000000e+00 : f32
    %44 = vector.broadcast %cst_21 : f32 to vector<1x8xf32>
    %45 = arith.subf %44, %37 : vector<1x8xf32>
    %46 = arith.mulf %45, %43 : vector<1x8xf32>
    %47 = arith.mulf %37, %17 : vector<1x8xf32>
    %48 = arith.addf %46, %47 : vector<1x8xf32>
    %cst_22 = arith.constant dense<0.000000e+00> : vector<1x384xf32>
    %49 = tpu.matmul %48, %10, %cst_22 {dimension_numbers = #tpu.dot_dimension_numbers<[1], [0], [0], [1], [0, 0, 1, 1], [], []>} : vector<1x8xf32>, vector<8x384xf32>, vector<1x384xf32> -> vector<1x384xf32>
    %50 = vector.extract_strided_slice %49 {offsets = [0, 0], sizes = [1, 8], strides = [1, 1]} : vector<1x384xf32> to vector<1x8xf32>
    %51 = vector.extract_strided_slice %19 {offsets = [0, 0], sizes = [1, 8], strides = [1, 1]} : vector<1x384xf32> to vector<1x8xf32>
    %52 = arith.addf %50, %51 : vector<1x8xf32>
    %53 = arith.addf %52, %13 : vector<1x8xf32>
    %54 = arith.negf %53 : vector<1x8xf32>
    %55 = math.exp %54 : vector<1x8xf32>
    %cst_23 = arith.constant 1.000000e+00 : f32
    %56 = vector.broadcast %cst_23 : f32 to vector<1x8xf32>
    %57 = arith.addf %56, %55 : vector<1x8xf32>
    %58 = arith.divf %56, %57 : vector<1x8xf32>
    %59 = vector.extract_strided_slice %49 {offsets = [0, 128], sizes = [1, 8], strides = [1, 1]} : vector<1x384xf32> to vector<1x8xf32>
    %60 = vector.extract_strided_slice %19 {offsets = [0, 128], sizes = [1, 8], strides = [1, 1]} : vector<1x384xf32> to vector<1x8xf32>
    %61 = arith.addf %59, %60 : vector<1x8xf32>
    %62 = arith.addf %61, %14 : vector<1x8xf32>
    %63 = arith.negf %62 : vector<1x8xf32>
    %64 = math.exp %63 : vector<1x8xf32>
    %cst_24 = arith.constant 1.000000e+00 : f32
    %65 = vector.broadcast %cst_24 : f32 to vector<1x8xf32>
    %66 = arith.addf %65, %64 : vector<1x8xf32>
    %67 = arith.divf %65, %66 : vector<1x8xf32>
    %68 = vector.extract_strided_slice %49 {offsets = [0, 256], sizes = [1, 8], strides = [1, 1]} : vector<1x384xf32> to vector<1x8xf32>
    %69 = arith.addf %68, %15 : vector<1x8xf32>
    %70 = vector.extract_strided_slice %19 {offsets = [0, 256], sizes = [1, 8], strides = [1, 1]} : vector<1x384xf32> to vector<1x8xf32>
    %71 = arith.addf %70, %16 : vector<1x8xf32>
    %72 = arith.mulf %58, %71 : vector<1x8xf32>
    %73 = arith.addf %69, %72 : vector<1x8xf32>
    %74 = math.tanh %73 : vector<1x8xf32>
    %cst_25 = arith.constant 1.000000e+00 : f32
    %75 = vector.broadcast %cst_25 : f32 to vector<1x8xf32>
    %76 = arith.subf %75, %67 : vector<1x8xf32>
    %77 = arith.mulf %76, %74 : vector<1x8xf32>
    %78 = arith.mulf %67, %18 : vector<1x8xf32>
    %79 = arith.addf %77, %78 : vector<1x8xf32>
    %c0_26 = arith.constant 0 : index
    %c0_27 = arith.constant 0 : index
    %80 = vector.load %arg4[%c0_26, %c0_27] : memref<8x8xf32, #tpu.memory_space<vmem>>, vector<1x8xf32>
    tpu.vector_store %arg4[%c0_26, %c0_27], %79 {strides = array<i32>} : memref<8x8xf32, #tpu.memory_space<vmem>>, vector<1x8xf32>,
    %cst_28 = arith.constant dense<0.000000e+00> : vector<1x384xf32>
    %81 = tpu.matmul %79, %11, %cst_28 {dimension_numbers = #tpu.dot_dimension_numbers<[1], [0], [0], [1], [0, 0, 1, 1], [], []>} : vector<1x8xf32>, vector<8x384xf32>, vector<1x384xf32> -> vector<1x384xf32>
    %cst_29 = arith.constant dense<0.000000e+00> : vector<1x384xf32>
    %82 = tpu.matmul %48, %9, %cst_29 {dimension_numbers = #tpu.dot_dimension_numbers<[1], [0], [0], [1], [0, 0, 1, 1], [], []>} : vector<1x8xf32>, vector<8x384xf32>, vector<1x384xf32> -> vector<1x384xf32>
    %c1 = arith.constant 1 : index
    %c0_30 = arith.constant 0 : index
    %83 = vector.load %arg3[%c1, %c0_30] : memref<8x384xf32, #tpu.memory_space<vmem>>, vector<1x384xf32>
    %84 = vector.extract_strided_slice %83 {offsets = [0, 0], sizes = [1, 8], strides = [1, 1]} : vector<1x384xf32> to vector<1x8xf32>
    %85 = vector.extract_strided_slice %82 {offsets = [0, 0], sizes = [1, 8], strides = [1, 1]} : vector<1x384xf32> to vector<1x8xf32>
    %86 = arith.addf %84, %85 : vector<1x8xf32>
    %87 = arith.negf %86 : vector<1x8xf32>
    %88 = math.exp %87 : vector<1x8xf32>
    %cst_31 = arith.constant 1.000000e+00 : f32
    %89 = vector.broadcast %cst_31 : f32 to vector<1x8xf32>
    %90 = arith.addf %89, %88 : vector<1x8xf32>
    %91 = arith.divf %89, %90 : vector<1x8xf32>
    %92 = vector.extract_strided_slice %83 {offsets = [0, 128], sizes = [1, 8], strides = [1, 1]} : vector<1x384xf32> to vector<1x8xf32>
    %93 = vector.extract_strided_slice %82 {offsets = [0, 128], sizes = [1, 8], strides = [1, 1]} : vector<1x384xf32> to vector<1x8xf32>
    %94 = arith.addf %92, %93 : vector<1x8xf32>
    %95 = arith.negf %94 : vector<1x8xf32>
    %96 = math.exp %95 : vector<1x8xf32>
    %cst_32 = arith.constant 1.000000e+00 : f32
    %97 = vector.broadcast %cst_32 : f32 to vector<1x8xf32>
    %98 = arith.addf %97, %96 : vector<1x8xf32>
    %99 = arith.divf %97, %98 : vector<1x8xf32>
    %100 = vector.extract_strided_slice %83 {offsets = [0, 256], sizes = [1, 8], strides = [1, 1]} : vector<1x384xf32> to vector<1x8xf32>
    %101 = vector.extract_strided_slice %82 {offsets = [0, 256], sizes = [1, 8], strides = [1, 1]} : vector<1x384xf32> to vector<1x8xf32>
    %102 = arith.addf %101, %12 : vector<1x8xf32>
    %103 = arith.mulf %91, %102 : vector<1x8xf32>
    %104 = arith.addf %100, %103 : vector<1x8xf32>
    %105 = math.tanh %104 : vector<1x8xf32>
    %cst_33 = arith.constant 1.000000e+00 : f32
    %106 = vector.broadcast %cst_33 : f32 to vector<1x8xf32>
    %107 = arith.subf %106, %99 : vector<1x8xf32>
    %108 = arith.mulf %107, %105 : vector<1x8xf32>
    %109 = arith.mulf %99, %48 : vector<1x8xf32>
    %110 = arith.addf %108, %109 : vector<1x8xf32>
    %cst_34 = arith.constant dense<0.000000e+00> : vector<1x384xf32>
    %111 = tpu.matmul %110, %10, %cst_34 {dimension_numbers = #tpu.dot_dimension_numbers<[1], [0], [0], [1], [0, 0, 1, 1], [], []>} : vector<1x8xf32>, vector<8x384xf32>, vector<1x384xf32> -> vector<1x384xf32>
    %112 = vector.extract_strided_slice %111 {offsets = [0, 0], sizes = [1, 8], strides = [1, 1]} : vector<1x384xf32> to vector<1x8xf32>
    %113 = vector.extract_strided_slice %81 {offsets = [0, 0], sizes = [1, 8], strides = [1, 1]} : vector<1x384xf32> to vector<1x8xf32>
    %114 = arith.addf %112, %113 : vector<1x8xf32>
    %115 = arith.addf %114, %13 : vector<1x8xf32>
    %116 = arith.negf %115 : vector<1x8xf32>
    %117 = math.exp %116 : vector<1x8xf32>
    %cst_35 = arith.constant 1.000000e+00 : f32
    %118 = vector.broadcast %cst_35 : f32 to vector<1x8xf32>
    %119 = arith.addf %118, %117 : vector<1x8xf32>
    %120 = arith.divf %118, %119 : vector<1x8xf32>
    %121 = vector.extract_strided_slice %111 {offsets = [0, 128], sizes = [1, 8], strides = [1, 1]} : vector<1x384xf32> to vector<1x8xf32>
    %122 = vector.extract_strided_slice %81 {offsets = [0, 128], sizes = [1, 8], strides = [1, 1]} : vector<1x384xf32> to vector<1x8xf32>
    %123 = arith.addf %121, %122 : vector<1x8xf32>
    %124 = arith.addf %123, %14 : vector<1x8xf32>
    %125 = arith.negf %124 : vector<1x8xf32>
    %126 = math.exp %125 : vector<1x8xf32>
    %cst_36 = arith.constant 1.000000e+00 : f32
    %127 = vector.broadcast %cst_36 : f32 to vector<1x8xf32>
    %128 = arith.addf %127, %126 : vector<1x8xf32>
    %129 = arith.divf %127, %128 : vector<1x8xf32>
    %130 = vector.extract_strided_slice %111 {offsets = [0, 256], sizes = [1, 8], strides = [1, 1]} : vector<1x384xf32> to vector<1x8xf32>
    %131 = arith.addf %130, %15 : vector<1x8xf32>
    %132 = vector.extract_strided_slice %81 {offsets = [0, 256], sizes = [1, 8], strides = [1, 1]} : vector<1x384xf32> to vector<1x8xf32>
    %133 = arith.addf %132, %16 : vector<1x8xf32>
    %134 = arith.mulf %120, %133 : vector<1x8xf32>
    %135 = arith.addf %131, %134 : vector<1x8xf32>
    %136 = math.tanh %135 : vector<1x8xf32>
    %cst_37 = arith.constant 1.000000e+00 : f32
    %137 = vector.broadcast %cst_37 : f32 to vector<1x8xf32>
    %138 = arith.subf %137, %129 : vector<1x8xf32>
    %139 = arith.mulf %138, %136 : vector<1x8xf32>
    %140 = arith.mulf %129, %79 : vector<1x8xf32>
    %141 = arith.addf %139, %140 : vector<1x8xf32>
    %c1_38 = arith.constant 1 : index
    %c0_39 = arith.constant 0 : index
    %142 = vector.load %arg4[%c1_38, %c0_39] : memref<8x8xf32, #tpu.memory_space<vmem>>, vector<1x8xf32>
    tpu.vector_store %arg4[%c1_38, %c0_39], %141 {strides = array<i32>} : memref<8x8xf32, #tpu.memory_space<vmem>>, vector<1x8xf32>,
    %cst_40 = arith.constant dense<0.000000e+00> : vector<1x384xf32>
    %143 = tpu.matmul %141, %11, %cst_40 {dimension_numbers = #tpu.dot_dimension_numbers<[1], [0], [0], [1], [0, 0, 1, 1], [], []>} : vector<1x8xf32>, vector<8x384xf32>, vector<1x384xf32> -> vector<1x384xf32>
    %cst_41 = arith.constant dense<0.000000e+00> : vector<1x384xf32>
    %144 = tpu.matmul %110, %9, %cst_41 {dimension_numbers = #tpu.dot_dimension_numbers<[1], [0], [0], [1], [0, 0, 1, 1], [], []>} : vector<1x8xf32>, vector<8x384xf32>, vector<1x384xf32> -> vector<1x384xf32>
    %c2 = arith.constant 2 : index
    %c0_42 = arith.constant 0 : index
    %145 = vector.load %arg3[%c2, %c0_42] : memref<8x384xf32, #tpu.memory_space<vmem>>, vector<1x384xf32>
    %146 = vector.extract_strided_slice %145 {offsets = [0, 0], sizes = [1, 8], strides = [1, 1]} : vector<1x384xf32> to vector<1x8xf32>
    %147 = vector.extract_strided_slice %144 {offsets = [0, 0], sizes = [1, 8], strides = [1, 1]} : vector<1x384xf32> to vector<1x8xf32>
    %148 = arith.addf %146, %147 : vector<1x8xf32>
    %149 = arith.negf %148 : vector<1x8xf32>
    %150 = math.exp %149 : vector<1x8xf32>
    %cst_43 = arith.constant 1.000000e+00 : f32
    %151 = vector.broadcast %cst_43 : f32 to vector<1x8xf32>
    %152 = arith.addf %151, %150 : vector<1x8xf32>
    %153 = arith.divf %151, %152 : vector<1x8xf32>
    %154 = vector.extract_strided_slice %145 {offsets = [0, 128], sizes = [1, 8], strides = [1, 1]} : vector<1x384xf32> to vector<1x8xf32>
    %155 = vector.extract_strided_slice %144 {offsets = [0, 128], sizes = [1, 8], strides = [1, 1]} : vector<1x384xf32> to vector<1x8xf32>
    %156 = arith.addf %154, %155 : vector<1x8xf32>
    %157 = arith.negf %156 : vector<1x8xf32>
    %158 = math.exp %157 : vector<1x8xf32>
    %cst_44 = arith.constant 1.000000e+00 : f32
    %159 = vector.broadcast %cst_44 : f32 to vector<1x8xf32>
    %160 = arith.addf %159, %158 : vector<1x8xf32>
    %161 = arith.divf %159, %160 : vector<1x8xf32>
    %162 = vector.extract_strided_slice %145 {offsets = [0, 256], sizes = [1, 8], strides = [1, 1]} : vector<1x384xf32> to vector<1x8xf32>
    %163 = vector.extract_strided_slice %144 {offsets = [0, 256], sizes = [1, 8], strides = [1, 1]} : vector<1x384xf32> to vector<1x8xf32>
    %164 = arith.addf %163, %12 : vector<1x8xf32>
    %165 = arith.mulf %153, %164 : vector<1x8xf32>
    %166 = arith.addf %162, %165 : vector<1x8xf32>
    %167 = math.tanh %166 : vector<1x8xf32>
    %cst_45 = arith.constant 1.000000e+00 : f32
    %168 = vector.broadcast %cst_45 : f32 to vector<1x8xf32>
    %169 = arith.subf %168, %161 : vector<1x8xf32>
    %170 = arith.mulf %169, %167 : vector<1x8xf32>
    %171 = arith.mulf %161, %110 : vector<1x8xf32>
    %172 = arith.addf %170, %171 : vector<1x8xf32>
    %cst_46 = arith.constant dense<0.000000e+00> : vector<1x384xf32>
    %173 = tpu.matmul %172, %10, %cst_46 {dimension_numbers = #tpu.dot_dimension_numbers<[1], [0], [0], [1], [0, 0, 1, 1], [], []>} : vector<1x8xf32>, vector<8x384xf32>, vector<1x384xf32> -> vector<1x384xf32>
    %174 = vector.extract_strided_slice %173 {offsets = [0, 0], sizes = [1, 8], strides = [1, 1]} : vector<1x384xf32> to vector<1x8xf32>
    %175 = vector.extract_strided_slice %143 {offsets = [0, 0], sizes = [1, 8], strides = [1, 1]} : vector<1x384xf32> to vector<1x8xf32>
    %176 = arith.addf %174, %175 : vector<1x8xf32>
    %177 = arith.addf %176, %13 : vector<1x8xf32>
    %178 = arith.negf %177 : vector<1x8xf32>
    %179 = math.exp %178 : vector<1x8xf32>
    %cst_47 = arith.constant 1.000000e+00 : f32
    %180 = vector.broadcast %cst_47 : f32 to vector<1x8xf32>
    %181 = arith.addf %180, %179 : vector<1x8xf32>
    %182 = arith.divf %180, %181 : vector<1x8xf32>
    %183 = vector.extract_strided_slice %173 {offsets = [0, 128], sizes = [1, 8], strides = [1, 1]} : vector<1x384xf32> to vector<1x8xf32>
    %184 = vector.extract_strided_slice %143 {offsets = [0, 128], sizes = [1, 8], strides = [1, 1]} : vector<1x384xf32> to vector<1x8xf32>
    %185 = arith.addf %183, %184 : vector<1x8xf32>
    %186 = arith.addf %185, %14 : vector<1x8xf32>
    %187 = arith.negf %186 : vector<1x8xf32>
    %188 = math.exp %187 : vector<1x8xf32>
    %cst_48 = arith.constant 1.000000e+00 : f32
    %189 = vector.broadcast %cst_48 : f32 to vector<1x8xf32>
    %190 = arith.addf %189, %188 : vector<1x8xf32>
    %191 = arith.divf %189, %190 : vector<1x8xf32>
    %192 = vector.extract_strided_slice %173 {offsets = [0, 256], sizes = [1, 8], strides = [1, 1]} : vector<1x384xf32> to vector<1x8xf32>
    %193 = arith.addf %192, %15 : vector<1x8xf32>
    %194 = vector.extract_strided_slice %143 {offsets = [0, 256], sizes = [1, 8], strides = [1, 1]} : vector<1x384xf32> to vector<1x8xf32>
    %195 = arith.addf %194, %16 : vector<1x8xf32>
    %196 = arith.mulf %182, %195 : vector<1x8xf32>
    %197 = arith.addf %193, %196 : vector<1x8xf32>
    %198 = math.tanh %197 : vector<1x8xf32>
    %cst_49 = arith.constant 1.000000e+00 : f32
    %199 = vector.broadcast %cst_49 : f32 to vector<1x8xf32>
    %200 = arith.subf %199, %191 : vector<1x8xf32>
    %201 = arith.mulf %200, %198 : vector<1x8xf32>
    %202 = arith.mulf %191, %141 : vector<1x8xf32>
    %203 = arith.addf %201, %202 : vector<1x8xf32>
    %c2_50 = arith.constant 2 : index
    %c0_51 = arith.constant 0 : index
    %204 = vector.load %arg4[%c2_50, %c0_51] : memref<8x8xf32, #tpu.memory_space<vmem>>, vector<1x8xf32>
    tpu.vector_store %arg4[%c2_50, %c0_51], %203 {strides = array<i32>} : memref<8x8xf32, #tpu.memory_space<vmem>>, vector<1x8xf32>,
    %cst_52 = arith.constant dense<0.000000e+00> : vector<1x384xf32>
    %205 = tpu.matmul %203, %11, %cst_52 {dimension_numbers = #tpu.dot_dimension_numbers<[1], [0], [0], [1], [0, 0, 1, 1], [], []>} : vector<1x8xf32>, vector<8x384xf32>, vector<1x384xf32> -> vector<1x384xf32>
    %cst_53 = arith.constant dense<0.000000e+00> : vector<1x384xf32>
    %206 = tpu.matmul %172, %9, %cst_53 {dimension_numbers = #tpu.dot_dimension_numbers<[1], [0], [0], [1], [0, 0, 1, 1], [], []>} : vector<1x8xf32>, vector<8x384xf32>, vector<1x384xf32> -> vector<1x384xf32>
    %c3 = arith.constant 3 : index
    %c0_54 = arith.constant 0 : index
    %207 = vector.load %arg3[%c3, %c0_54] : memref<8x384xf32, #tpu.memory_space<vmem>>, vector<1x384xf32>
    %208 = vector.extract_strided_slice %207 {offsets = [0, 0], sizes = [1, 8], strides = [1, 1]} : vector<1x384xf32> to vector<1x8xf32>
    %209 = vector.extract_strided_slice %206 {offsets = [0, 0], sizes = [1, 8], strides = [1, 1]} : vector<1x384xf32> to vector<1x8xf32>
    %210 = arith.addf %208, %209 : vector<1x8xf32>
    %211 = arith.negf %210 : vector<1x8xf32>
    %212 = math.exp %211 : vector<1x8xf32>
    %cst_55 = arith.constant 1.000000e+00 : f32
    %213 = vector.broadcast %cst_55 : f32 to vector<1x8xf32>
    %214 = arith.addf %213, %212 : vector<1x8xf32>
    %215 = arith.divf %213, %214 : vector<1x8xf32>
    %216 = vector.extract_strided_slice %207 {offsets = [0, 128], sizes = [1, 8], strides = [1, 1]} : vector<1x384xf32> to vector<1x8xf32>
    %217 = vector.extract_strided_slice %206 {offsets = [0, 128], sizes = [1, 8], strides = [1, 1]} : vector<1x384xf32> to vector<1x8xf32>
    %218 = arith.addf %216, %217 : vector<1x8xf32>
    %219 = arith.negf %218 : vector<1x8xf32>
    %220 = math.exp %219 : vector<1x8xf32>
    %cst_56 = arith.constant 1.000000e+00 : f32
    %221 = vector.broadcast %cst_56 : f32 to vector<1x8xf32>
    %222 = arith.addf %221, %220 : vector<1x8xf32>
    %223 = arith.divf %221, %222 : vector<1x8xf32>
    %224 = vector.extract_strided_slice %207 {offsets = [0, 256], sizes = [1, 8], strides = [1, 1]} : vector<1x384xf32> to vector<1x8xf32>
    %225 = vector.extract_strided_slice %206 {offsets = [0, 256], sizes = [1, 8], strides = [1, 1]} : vector<1x384xf32> to vector<1x8xf32>
    %226 = arith.addf %225, %12 : vector<1x8xf32>
    %227 = arith.mulf %215, %226 : vector<1x8xf32>
    %228 = arith.addf %224, %227 : vector<1x8xf32>
    %229 = math.tanh %228 : vector<1x8xf32>
    %cst_57 = arith.constant 1.000000e+00 : f32
    %230 = vector.broadcast %cst_57 : f32 to vector<1x8xf32>
    %231 = arith.subf %230, %223 : vector<1x8xf32>
    %232 = arith.mulf %231, %229 : vector<1x8xf32>
    %233 = arith.mulf %223, %172 : vector<1x8xf32>
    %234 = arith.addf %232, %233 : vector<1x8xf32>
    %cst_58 = arith.constant dense<0.000000e+00> : vector<1x384xf32>
    %235 = tpu.matmul %234, %10, %cst_58 {dimension_numbers = #tpu.dot_dimension_numbers<[1], [0], [0], [1], [0, 0, 1, 1], [], []>} : vector<1x8xf32>, vector<8x384xf32>, vector<1x384xf32> -> vector<1x384xf32>
    %236 = vector.extract_strided_slice %235 {offsets = [0, 0], sizes = [1, 8], strides = [1, 1]} : vector<1x384xf32> to vector<1x8xf32>
    %237 = vector.extract_strided_slice %205 {offsets = [0, 0], sizes = [1, 8], strides = [1, 1]} : vector<1x384xf32> to vector<1x8xf32>
    %238 = arith.addf %236, %237 : vector<1x8xf32>
    %239 = arith.addf %238, %13 : vector<1x8xf32>
    %240 = arith.negf %239 : vector<1x8xf32>
    %241 = math.exp %240 : vector<1x8xf32>
    %cst_59 = arith.constant 1.000000e+00 : f32
    %242 = vector.broadcast %cst_59 : f32 to vector<1x8xf32>
    %243 = arith.addf %242, %241 : vector<1x8xf32>
    %244 = arith.divf %242, %243 : vector<1x8xf32>
    %245 = vector.extract_strided_slice %235 {offsets = [0, 128], sizes = [1, 8], strides = [1, 1]} : vector<1x384xf32> to vector<1x8xf32>
    %246 = vector.extract_strided_slice %205 {offsets = [0, 128], sizes = [1, 8], strides = [1, 1]} : vector<1x384xf32> to vector<1x8xf32>
    %247 = arith.addf %245, %246 : vector<1x8xf32>
    %248 = arith.addf %247, %14 : vector<1x8xf32>
    %249 = arith.negf %248 : vector<1x8xf32>
    %250 = math.exp %249 : vector<1x8xf32>
    %cst_60 = arith.constant 1.000000e+00 : f32
    %251 = vector.broadcast %cst_60 : f32 to vector<1x8xf32>
    %252 = arith.addf %251, %250 : vector<1x8xf32>
    %253 = arith.divf %251, %252 : vector<1x8xf32>
    %254 = vector.extract_strided_slice %235 {offsets = [0, 256], sizes = [1, 8], strides = [1, 1]} : vector<1x384xf32> to vector<1x8xf32>
    %255 = arith.addf %254, %15 : vector<1x8xf32>
    %256 = vector.extract_strided_slice %205 {offsets = [0, 256], sizes = [1, 8], strides = [1, 1]} : vector<1x384xf32> to vector<1x8xf32>
    %257 = arith.addf %256, %16 : vector<1x8xf32>
    %258 = arith.mulf %244, %257 : vector<1x8xf32>
    %259 = arith.addf %255, %258 : vector<1x8xf32>
    %260 = math.tanh %259 : vector<1x8xf32>
    %cst_61 = arith.constant 1.000000e+00 : f32
    %261 = vector.broadcast %cst_61 : f32 to vector<1x8xf32>
    %262 = arith.subf %261, %253 : vector<1x8xf32>
    %263 = arith.mulf %262, %260 : vector<1x8xf32>
    %264 = arith.mulf %253, %203 : vector<1x8xf32>
    %265 = arith.addf %263, %264 : vector<1x8xf32>
    %c3_62 = arith.constant 3 : index
    %c0_63 = arith.constant 0 : index
    %266 = vector.load %arg4[%c3_62, %c0_63] : memref<8x8xf32, #tpu.memory_space<vmem>>, vector<1x8xf32>
    tpu.vector_store %arg4[%c3_62, %c0_63], %265 {strides = array<i32>} : memref<8x8xf32, #tpu.memory_space<vmem>>, vector<1x8xf32>,
    %cst_64 = arith.constant dense<0.000000e+00> : vector<1x384xf32>
    %267 = tpu.matmul %265, %11, %cst_64 {dimension_numbers = #tpu.dot_dimension_numbers<[1], [0], [0], [1], [0, 0, 1, 1], [], []>} : vector<1x8xf32>, vector<8x384xf32>, vector<1x384xf32> -> vector<1x384xf32>
    %cst_65 = arith.constant dense<0.000000e+00> : vector<1x384xf32>
    %268 = tpu.matmul %234, %9, %cst_65 {dimension_numbers = #tpu.dot_dimension_numbers<[1], [0], [0], [1], [0, 0, 1, 1], [], []>} : vector<1x8xf32>, vector<8x384xf32>, vector<1x384xf32> -> vector<1x384xf32>
    %c4 = arith.constant 4 : index
    %c0_66 = arith.constant 0 : index
    %269 = vector.load %arg3[%c4, %c0_66] : memref<8x384xf32, #tpu.memory_space<vmem>>, vector<1x384xf32>
    %270 = vector.extract_strided_slice %269 {offsets = [0, 0], sizes = [1, 8], strides = [1, 1]} : vector<1x384xf32> to vector<1x8xf32>
    %271 = vector.extract_strided_slice %268 {offsets = [0, 0], sizes = [1, 8], strides = [1, 1]} : vector<1x384xf32> to vector<1x8xf32>
    %272 = arith.addf %270, %271 : vector<1x8xf32>
    %273 = arith.negf %272 : vector<1x8xf32>
    %274 = math.exp %273 : vector<1x8xf32>
    %cst_67 = arith.constant 1.000000e+00 : f32
    %275 = vector.broadcast %cst_67 : f32 to vector<1x8xf32>
    %276 = arith.addf %275, %274 : vector<1x8xf32>
    %277 = arith.divf %275, %276 : vector<1x8xf32>
    %278 = vector.extract_strided_slice %269 {offsets = [0, 128], sizes = [1, 8], strides = [1, 1]} : vector<1x384xf32> to vector<1x8xf32>
    %279 = vector.extract_strided_slice %268 {offsets = [0, 128], sizes = [1, 8], strides = [1, 1]} : vector<1x384xf32> to vector<1x8xf32>
    %280 = arith.addf %278, %279 : vector<1x8xf32>
    %281 = arith.negf %280 : vector<1x8xf32>
    %282 = math.exp %281 : vector<1x8xf32>
    %cst_68 = arith.constant 1.000000e+00 : f32
    %283 = vector.broadcast %cst_68 : f32 to vector<1x8xf32>
    %284 = arith.addf %283, %282 : vector<1x8xf32>
    %285 = arith.divf %283, %284 : vector<1x8xf32>
    %286 = vector.extract_strided_slice %269 {offsets = [0, 256], sizes = [1, 8], strides = [1, 1]} : vector<1x384xf32> to vector<1x8xf32>
    %287 = vector.extract_strided_slice %268 {offsets = [0, 256], sizes = [1, 8], strides = [1, 1]} : vector<1x384xf32> to vector<1x8xf32>
    %288 = arith.addf %287, %12 : vector<1x8xf32>
    %289 = arith.mulf %277, %288 : vector<1x8xf32>
    %290 = arith.addf %286, %289 : vector<1x8xf32>
    %291 = math.tanh %290 : vector<1x8xf32>
    %cst_69 = arith.constant 1.000000e+00 : f32
    %292 = vector.broadcast %cst_69 : f32 to vector<1x8xf32>
    %293 = arith.subf %292, %285 : vector<1x8xf32>
    %294 = arith.mulf %293, %291 : vector<1x8xf32>
    %295 = arith.mulf %285, %234 : vector<1x8xf32>
    %296 = arith.addf %294, %295 : vector<1x8xf32>
    %cst_70 = arith.constant dense<0.000000e+00> : vector<1x384xf32>
    %297 = tpu.matmul %296, %10, %cst_70 {dimension_numbers = #tpu.dot_dimension_numbers<[1], [0], [0], [1], [0, 0, 1, 1], [], []>} : vector<1x8xf32>, vector<8x384xf32>, vector<1x384xf32> -> vector<1x384xf32>
    %298 = vector.extract_strided_slice %297 {offsets = [0, 0], sizes = [1, 8], strides = [1, 1]} : vector<1x384xf32> to vector<1x8xf32>
    %299 = vector.extract_strided_slice %267 {offsets = [0, 0], sizes = [1, 8], strides = [1, 1]} : vector<1x384xf32> to vector<1x8xf32>
    %300 = arith.addf %298, %299 : vector<1x8xf32>
    %301 = arith.addf %300, %13 : vector<1x8xf32>
    %302 = arith.negf %301 : vector<1x8xf32>
    %303 = math.exp %302 : vector<1x8xf32>
    %cst_71 = arith.constant 1.000000e+00 : f32
    %304 = vector.broadcast %cst_71 : f32 to vector<1x8xf32>
    %305 = arith.addf %304, %303 : vector<1x8xf32>
    %306 = arith.divf %304, %305 : vector<1x8xf32>
    %307 = vector.extract_strided_slice %297 {offsets = [0, 128], sizes = [1, 8], strides = [1, 1]} : vector<1x384xf32> to vector<1x8xf32>
    %308 = vector.extract_strided_slice %267 {offsets = [0, 128], sizes = [1, 8], strides = [1, 1]} : vector<1x384xf32> to vector<1x8xf32>
    %309 = arith.addf %307, %308 : vector<1x8xf32>
    %310 = arith.addf %309, %14 : vector<1x8xf32>
    %311 = arith.negf %310 : vector<1x8xf32>
    %312 = math.exp %311 : vector<1x8xf32>
    %cst_72 = arith.constant 1.000000e+00 : f32
    %313 = vector.broadcast %cst_72 : f32 to vector<1x8xf32>
    %314 = arith.addf %313, %312 : vector<1x8xf32>
    %315 = arith.divf %313, %314 : vector<1x8xf32>
    %316 = vector.extract_strided_slice %297 {offsets = [0, 256], sizes = [1, 8], strides = [1, 1]} : vector<1x384xf32> to vector<1x8xf32>
    %317 = arith.addf %316, %15 : vector<1x8xf32>
    %318 = vector.extract_strided_slice %267 {offsets = [0, 256], sizes = [1, 8], strides = [1, 1]} : vector<1x384xf32> to vector<1x8xf32>
    %319 = arith.addf %318, %16 : vector<1x8xf32>
    %320 = arith.mulf %306, %319 : vector<1x8xf32>
    %321 = arith.addf %317, %320 : vector<1x8xf32>
    %322 = math.tanh %321 : vector<1x8xf32>
    %cst_73 = arith.constant 1.000000e+00 : f32
    %323 = vector.broadcast %cst_73 : f32 to vector<1x8xf32>
    %324 = arith.subf %323, %315 : vector<1x8xf32>
    %325 = arith.mulf %324, %322 : vector<1x8xf32>
    %326 = arith.mulf %315, %265 : vector<1x8xf32>
    %327 = arith.addf %325, %326 : vector<1x8xf32>
    %c4_74 = arith.constant 4 : index
    %c0_75 = arith.constant 0 : index
    %328 = vector.load %arg4[%c4_74, %c0_75] : memref<8x8xf32, #tpu.memory_space<vmem>>, vector<1x8xf32>
    tpu.vector_store %arg4[%c4_74, %c0_75], %327 {strides = array<i32>} : memref<8x8xf32, #tpu.memory_space<vmem>>, vector<1x8xf32>,
    %cst_76 = arith.constant dense<0.000000e+00> : vector<1x384xf32>
    %329 = tpu.matmul %327, %11, %cst_76 {dimension_numbers = #tpu.dot_dimension_numbers<[1], [0], [0], [1], [0, 0, 1, 1], [], []>} : vector<1x8xf32>, vector<8x384xf32>, vector<1x384xf32> -> vector<1x384xf32>
    %cst_77 = arith.constant dense<0.000000e+00> : vector<1x384xf32>
    %330 = tpu.matmul %296, %9, %cst_77 {dimension_numbers = #tpu.dot_dimension_numbers<[1], [0], [0], [1], [0, 0, 1, 1], [], []>} : vector<1x8xf32>, vector<8x384xf32>, vector<1x384xf32> -> vector<1x384xf32>
    %c5 = arith.constant 5 : index
    %c0_78 = arith.constant 0 : index
    %331 = vector.load %arg3[%c5, %c0_78] : memref<8x384xf32, #tpu.memory_space<vmem>>, vector<1x384xf32>
    %332 = vector.extract_strided_slice %331 {offsets = [0, 0], sizes = [1, 8], strides = [1, 1]} : vector<1x384xf32> to vector<1x8xf32>
    %333 = vector.extract_strided_slice %330 {offsets = [0, 0], sizes = [1, 8], strides = [1, 1]} : vector<1x384xf32> to vector<1x8xf32>
    %334 = arith.addf %332, %333 : vector<1x8xf32>
    %335 = arith.negf %334 : vector<1x8xf32>
    %336 = math.exp %335 : vector<1x8xf32>
    %cst_79 = arith.constant 1.000000e+00 : f32
    %337 = vector.broadcast %cst_79 : f32 to vector<1x8xf32>
    %338 = arith.addf %337, %336 : vector<1x8xf32>
    %339 = arith.divf %337, %338 : vector<1x8xf32>
    %340 = vector.extract_strided_slice %331 {offsets = [0, 128], sizes = [1, 8], strides = [1, 1]} : vector<1x384xf32> to vector<1x8xf32>
    %341 = vector.extract_strided_slice %330 {offsets = [0, 128], sizes = [1, 8], strides = [1, 1]} : vector<1x384xf32> to vector<1x8xf32>
    %342 = arith.addf %340, %341 : vector<1x8xf32>
    %343 = arith.negf %342 : vector<1x8xf32>
    %344 = math.exp %343 : vector<1x8xf32>
    %cst_80 = arith.constant 1.000000e+00 : f32
    %345 = vector.broadcast %cst_80 : f32 to vector<1x8xf32>
    %346 = arith.addf %345, %344 : vector<1x8xf32>
    %347 = arith.divf %345, %346 : vector<1x8xf32>
    %348 = vector.extract_strided_slice %331 {offsets = [0, 256], sizes = [1, 8], strides = [1, 1]} : vector<1x384xf32> to vector<1x8xf32>
    %349 = vector.extract_strided_slice %330 {offsets = [0, 256], sizes = [1, 8], strides = [1, 1]} : vector<1x384xf32> to vector<1x8xf32>
    %350 = arith.addf %349, %12 : vector<1x8xf32>
    %351 = arith.mulf %339, %350 : vector<1x8xf32>
    %352 = arith.addf %348, %351 : vector<1x8xf32>
    %353 = math.tanh %352 : vector<1x8xf32>
    %cst_81 = arith.constant 1.000000e+00 : f32
    %354 = vector.broadcast %cst_81 : f32 to vector<1x8xf32>
    %355 = arith.subf %354, %347 : vector<1x8xf32>
    %356 = arith.mulf %355, %353 : vector<1x8xf32>
    %357 = arith.mulf %347, %296 : vector<1x8xf32>
    %358 = arith.addf %356, %357 : vector<1x8xf32>
    %cst_82 = arith.constant dense<0.000000e+00> : vector<1x384xf32>
    %359 = tpu.matmul %358, %10, %cst_82 {dimension_numbers = #tpu.dot_dimension_numbers<[1], [0], [0], [1], [0, 0, 1, 1], [], []>} : vector<1x8xf32>, vector<8x384xf32>, vector<1x384xf32> -> vector<1x384xf32>
    %360 = vector.extract_strided_slice %359 {offsets = [0, 0], sizes = [1, 8], strides = [1, 1]} : vector<1x384xf32> to vector<1x8xf32>
    %361 = vector.extract_strided_slice %329 {offsets = [0, 0], sizes = [1, 8], strides = [1, 1]} : vector<1x384xf32> to vector<1x8xf32>
    %362 = arith.addf %360, %361 : vector<1x8xf32>
    %363 = arith.addf %362, %13 : vector<1x8xf32>
    %364 = arith.negf %363 : vector<1x8xf32>
    %365 = math.exp %364 : vector<1x8xf32>
    %cst_83 = arith.constant 1.000000e+00 : f32
    %366 = vector.broadcast %cst_83 : f32 to vector<1x8xf32>
    %367 = arith.addf %366, %365 : vector<1x8xf32>
    %368 = arith.divf %366, %367 : vector<1x8xf32>
    %369 = vector.extract_strided_slice %359 {offsets = [0, 128], sizes = [1, 8], strides = [1, 1]} : vector<1x384xf32> to vector<1x8xf32>
    %370 = vector.extract_strided_slice %329 {offsets = [0, 128], sizes = [1, 8], strides = [1, 1]} : vector<1x384xf32> to vector<1x8xf32>
    %371 = arith.addf %369, %370 : vector<1x8xf32>
    %372 = arith.addf %371, %14 : vector<1x8xf32>
    %373 = arith.negf %372 : vector<1x8xf32>
    %374 = math.exp %373 : vector<1x8xf32>
    %cst_84 = arith.constant 1.000000e+00 : f32
    %375 = vector.broadcast %cst_84 : f32 to vector<1x8xf32>
    %376 = arith.addf %375, %374 : vector<1x8xf32>
    %377 = arith.divf %375, %376 : vector<1x8xf32>
    %378 = vector.extract_strided_slice %359 {offsets = [0, 256], sizes = [1, 8], strides = [1, 1]} : vector<1x384xf32> to vector<1x8xf32>
    %379 = arith.addf %378, %15 : vector<1x8xf32>
    %380 = vector.extract_strided_slice %329 {offsets = [0, 256], sizes = [1, 8], strides = [1, 1]} : vector<1x384xf32> to vector<1x8xf32>
    %381 = arith.addf %380, %16 : vector<1x8xf32>
    %382 = arith.mulf %368, %381 : vector<1x8xf32>
    %383 = arith.addf %379, %382 : vector<1x8xf32>
    %384 = math.tanh %383 : vector<1x8xf32>
    %cst_85 = arith.constant 1.000000e+00 : f32
    %385 = vector.broadcast %cst_85 : f32 to vector<1x8xf32>
    %386 = arith.subf %385, %377 : vector<1x8xf32>
    %387 = arith.mulf %386, %384 : vector<1x8xf32>
    %388 = arith.mulf %377, %327 : vector<1x8xf32>
    %389 = arith.addf %387, %388 : vector<1x8xf32>
    %c5_86 = arith.constant 5 : index
    %c0_87 = arith.constant 0 : index
    %390 = vector.load %arg4[%c5_86, %c0_87] : memref<8x8xf32, #tpu.memory_space<vmem>>, vector<1x8xf32>
    tpu.vector_store %arg4[%c5_86, %c0_87], %389 {strides = array<i32>} : memref<8x8xf32, #tpu.memory_space<vmem>>, vector<1x8xf32>,
    %cst_88 = arith.constant dense<0.000000e+00> : vector<1x384xf32>
    %391 = tpu.matmul %389, %11, %cst_88 {dimension_numbers = #tpu.dot_dimension_numbers<[1], [0], [0], [1], [0, 0, 1, 1], [], []>} : vector<1x8xf32>, vector<8x384xf32>, vector<1x384xf32> -> vector<1x384xf32>
    %cst_89 = arith.constant dense<0.000000e+00> : vector<1x384xf32>
    %392 = tpu.matmul %358, %9, %cst_89 {dimension_numbers = #tpu.dot_dimension_numbers<[1], [0], [0], [1], [0, 0, 1, 1], [], []>} : vector<1x8xf32>, vector<8x384xf32>, vector<1x384xf32> -> vector<1x384xf32>
    %c6 = arith.constant 6 : index
    %c0_90 = arith.constant 0 : index
    %393 = vector.load %arg3[%c6, %c0_90] : memref<8x384xf32, #tpu.memory_space<vmem>>, vector<1x384xf32>
    %394 = vector.extract_strided_slice %393 {offsets = [0, 0], sizes = [1, 8], strides = [1, 1]} : vector<1x384xf32> to vector<1x8xf32>
    %395 = vector.extract_strided_slice %392 {offsets = [0, 0], sizes = [1, 8], strides = [1, 1]} : vector<1x384xf32> to vector<1x8xf32>
    %396 = arith.addf %394, %395 : vector<1x8xf32>
    %397 = arith.negf %396 : vector<1x8xf32>
    %398 = math.exp %397 : vector<1x8xf32>
    %cst_91 = arith.constant 1.000000e+00 : f32
    %399 = vector.broadcast %cst_91 : f32 to vector<1x8xf32>
    %400 = arith.addf %399, %398 : vector<1x8xf32>
    %401 = arith.divf %399, %400 : vector<1x8xf32>
    %402 = vector.extract_strided_slice %393 {offsets = [0, 128], sizes = [1, 8], strides = [1, 1]} : vector<1x384xf32> to vector<1x8xf32>
    %403 = vector.extract_strided_slice %392 {offsets = [0, 128], sizes = [1, 8], strides = [1, 1]} : vector<1x384xf32> to vector<1x8xf32>
    %404 = arith.addf %402, %403 : vector<1x8xf32>
    %405 = arith.negf %404 : vector<1x8xf32>
    %406 = math.exp %405 : vector<1x8xf32>
    %cst_92 = arith.constant 1.000000e+00 : f32
    %407 = vector.broadcast %cst_92 : f32 to vector<1x8xf32>
    %408 = arith.addf %407, %406 : vector<1x8xf32>
    %409 = arith.divf %407, %408 : vector<1x8xf32>
    %410 = vector.extract_strided_slice %393 {offsets = [0, 256], sizes = [1, 8], strides = [1, 1]} : vector<1x384xf32> to vector<1x8xf32>
    %411 = vector.extract_strided_slice %392 {offsets = [0, 256], sizes = [1, 8], strides = [1, 1]} : vector<1x384xf32> to vector<1x8xf32>
    %412 = arith.addf %411, %12 : vector<1x8xf32>
    %413 = arith.mulf %401, %412 : vector<1x8xf32>
    %414 = arith.addf %410, %413 : vector<1x8xf32>
    %415 = math.tanh %414 : vector<1x8xf32>
    %cst_93 = arith.constant 1.000000e+00 : f32
    %416 = vector.broadcast %cst_93 : f32 to vector<1x8xf32>
    %417 = arith.subf %416, %409 : vector<1x8xf32>
    %418 = arith.mulf %417, %415 : vector<1x8xf32>
    %419 = arith.mulf %409, %358 : vector<1x8xf32>
    %420 = arith.addf %418, %419 : vector<1x8xf32>
    %cst_94 = arith.constant dense<0.000000e+00> : vector<1x384xf32>
    %421 = tpu.matmul %420, %10, %cst_94 {dimension_numbers = #tpu.dot_dimension_numbers<[1], [0], [0], [1], [0, 0, 1, 1], [], []>} : vector<1x8xf32>, vector<8x384xf32>, vector<1x384xf32> -> vector<1x384xf32>
    %422 = vector.extract_strided_slice %421 {offsets = [0, 0], sizes = [1, 8], strides = [1, 1]} : vector<1x384xf32> to vector<1x8xf32>
    %423 = vector.extract_strided_slice %391 {offsets = [0, 0], sizes = [1, 8], strides = [1, 1]} : vector<1x384xf32> to vector<1x8xf32>
    %424 = arith.addf %422, %423 : vector<1x8xf32>
    %425 = arith.addf %424, %13 : vector<1x8xf32>
    %426 = arith.negf %425 : vector<1x8xf32>
    %427 = math.exp %426 : vector<1x8xf32>
    %cst_95 = arith.constant 1.000000e+00 : f32
    %428 = vector.broadcast %cst_95 : f32 to vector<1x8xf32>
    %429 = arith.addf %428, %427 : vector<1x8xf32>
    %430 = arith.divf %428, %429 : vector<1x8xf32>
    %431 = vector.extract_strided_slice %421 {offsets = [0, 128], sizes = [1, 8], strides = [1, 1]} : vector<1x384xf32> to vector<1x8xf32>
    %432 = vector.extract_strided_slice %391 {offsets = [0, 128], sizes = [1, 8], strides = [1, 1]} : vector<1x384xf32> to vector<1x8xf32>
    %433 = arith.addf %431, %432 : vector<1x8xf32>
    %434 = arith.addf %433, %14 : vector<1x8xf32>
    %435 = arith.negf %434 : vector<1x8xf32>
    %436 = math.exp %435 : vector<1x8xf32>
    %cst_96 = arith.constant 1.000000e+00 : f32
    %437 = vector.broadcast %cst_96 : f32 to vector<1x8xf32>
    %438 = arith.addf %437, %436 : vector<1x8xf32>
    %439 = arith.divf %437, %438 : vector<1x8xf32>
    %440 = vector.extract_strided_slice %421 {offsets = [0, 256], sizes = [1, 8], strides = [1, 1]} : vector<1x384xf32> to vector<1x8xf32>
    %441 = arith.addf %440, %15 : vector<1x8xf32>
    %442 = vector.extract_strided_slice %391 {offsets = [0, 256], sizes = [1, 8], strides = [1, 1]} : vector<1x384xf32> to vector<1x8xf32>
    %443 = arith.addf %442, %16 : vector<1x8xf32>
    %444 = arith.mulf %430, %443 : vector<1x8xf32>
    %445 = arith.addf %441, %444 : vector<1x8xf32>
    %446 = math.tanh %445 : vector<1x8xf32>
    %cst_97 = arith.constant 1.000000e+00 : f32
    %447 = vector.broadcast %cst_97 : f32 to vector<1x8xf32>
    %448 = arith.subf %447, %439 : vector<1x8xf32>
    %449 = arith.mulf %448, %446 : vector<1x8xf32>
    %450 = arith.mulf %439, %389 : vector<1x8xf32>
    %451 = arith.addf %449, %450 : vector<1x8xf32>
    %c6_98 = arith.constant 6 : index
    %c0_99 = arith.constant 0 : index
    %452 = vector.load %arg4[%c6_98, %c0_99] : memref<8x8xf32, #tpu.memory_space<vmem>>, vector<1x8xf32>
    tpu.vector_store %arg4[%c6_98, %c0_99], %451 {strides = array<i32>} : memref<8x8xf32, #tpu.memory_space<vmem>>, vector<1x8xf32>,
    %cst_100 = arith.constant dense<0.000000e+00> : vector<1x384xf32>
    %453 = tpu.matmul %451, %11, %cst_100 {dimension_numbers = #tpu.dot_dimension_numbers<[1], [0], [0], [1], [0, 0, 1, 1], [], []>} : vector<1x8xf32>, vector<8x384xf32>, vector<1x384xf32> -> vector<1x384xf32>
    %cst_101 = arith.constant dense<0.000000e+00> : vector<1x384xf32>
    %454 = tpu.matmul %420, %9, %cst_101 {dimension_numbers = #tpu.dot_dimension_numbers<[1], [0], [0], [1], [0, 0, 1, 1], [], []>} : vector<1x8xf32>, vector<8x384xf32>, vector<1x384xf32> -> vector<1x384xf32>
    %c7 = arith.constant 7 : index
    %c0_102 = arith.constant 0 : index
    %455 = vector.load %arg3[%c7, %c0_102] : memref<8x384xf32, #tpu.memory_space<vmem>>, vector<1x384xf32>
    %456 = vector.extract_strided_slice %455 {offsets = [0, 0], sizes = [1, 8], strides = [1, 1]} : vector<1x384xf32> to vector<1x8xf32>
    %457 = vector.extract_strided_slice %454 {offsets = [0, 0], sizes = [1, 8], strides = [1, 1]} : vector<1x384xf32> to vector<1x8xf32>
    %458 = arith.addf %456, %457 : vector<1x8xf32>
    %459 = arith.negf %458 : vector<1x8xf32>
    %460 = math.exp %459 : vector<1x8xf32>
    %cst_103 = arith.constant 1.000000e+00 : f32
    %461 = vector.broadcast %cst_103 : f32 to vector<1x8xf32>
    %462 = arith.addf %461, %460 : vector<1x8xf32>
    %463 = arith.divf %461, %462 : vector<1x8xf32>
    %464 = vector.extract_strided_slice %455 {offsets = [0, 128], sizes = [1, 8], strides = [1, 1]} : vector<1x384xf32> to vector<1x8xf32>
    %465 = vector.extract_strided_slice %454 {offsets = [0, 128], sizes = [1, 8], strides = [1, 1]} : vector<1x384xf32> to vector<1x8xf32>
    %466 = arith.addf %464, %465 : vector<1x8xf32>
    %467 = arith.negf %466 : vector<1x8xf32>
    %468 = math.exp %467 : vector<1x8xf32>
    %cst_104 = arith.constant 1.000000e+00 : f32
    %469 = vector.broadcast %cst_104 : f32 to vector<1x8xf32>
    %470 = arith.addf %469, %468 : vector<1x8xf32>
    %471 = arith.divf %469, %470 : vector<1x8xf32>
    %472 = vector.extract_strided_slice %455 {offsets = [0, 256], sizes = [1, 8], strides = [1, 1]} : vector<1x384xf32> to vector<1x8xf32>
    %473 = vector.extract_strided_slice %454 {offsets = [0, 256], sizes = [1, 8], strides = [1, 1]} : vector<1x384xf32> to vector<1x8xf32>
    %474 = arith.addf %473, %12 : vector<1x8xf32>
    %475 = arith.mulf %463, %474 : vector<1x8xf32>
    %476 = arith.addf %472, %475 : vector<1x8xf32>
    %477 = math.tanh %476 : vector<1x8xf32>
    %cst_105 = arith.constant 1.000000e+00 : f32
    %478 = vector.broadcast %cst_105 : f32 to vector<1x8xf32>
    %479 = arith.subf %478, %471 : vector<1x8xf32>
    %480 = arith.mulf %479, %477 : vector<1x8xf32>
    %481 = arith.mulf %471, %420 : vector<1x8xf32>
    %482 = arith.addf %480, %481 : vector<1x8xf32>
    %cst_106 = arith.constant dense<0.000000e+00> : vector<1x384xf32>
    %483 = tpu.matmul %482, %10, %cst_106 {dimension_numbers = #tpu.dot_dimension_numbers<[1], [0], [0], [1], [0, 0, 1, 1], [], []>} : vector<1x8xf32>, vector<8x384xf32>, vector<1x384xf32> -> vector<1x384xf32>
    %484 = vector.extract_strided_slice %483 {offsets = [0, 0], sizes = [1, 8], strides = [1, 1]} : vector<1x384xf32> to vector<1x8xf32>
    %485 = vector.extract_strided_slice %453 {offsets = [0, 0], sizes = [1, 8], strides = [1, 1]} : vector<1x384xf32> to vector<1x8xf32>
    %486 = arith.addf %484, %485 : vector<1x8xf32>
    %487 = arith.addf %486, %13 : vector<1x8xf32>
    %488 = arith.negf %487 : vector<1x8xf32>
    %489 = math.exp %488 : vector<1x8xf32>
    %cst_107 = arith.constant 1.000000e+00 : f32
    %490 = vector.broadcast %cst_107 : f32 to vector<1x8xf32>
    %491 = arith.addf %490, %489 : vector<1x8xf32>
    %492 = arith.divf %490, %491 : vector<1x8xf32>
    %493 = vector.extract_strided_slice %483 {offsets = [0, 128], sizes = [1, 8], strides = [1, 1]} : vector<1x384xf32> to vector<1x8xf32>
    %494 = vector.extract_strided_slice %453 {offsets = [0, 128], sizes = [1, 8], strides = [1, 1]} : vector<1x384xf32> to vector<1x8xf32>
    %495 = arith.addf %493, %494 : vector<1x8xf32>
    %496 = arith.addf %495, %14 : vector<1x8xf32>
    %497 = arith.negf %496 : vector<1x8xf32>
    %498 = math.exp %497 : vector<1x8xf32>
    %cst_108 = arith.constant 1.000000e+00 : f32
    %499 = vector.broadcast %cst_108 : f32 to vector<1x8xf32>
    %500 = arith.addf %499, %498 : vector<1x8xf32>
    %501 = arith.divf %499, %500 : vector<1x8xf32>
    %502 = vector.extract_strided_slice %483 {offsets = [0, 256], sizes = [1, 8], strides = [1, 1]} : vector<1x384xf32> to vector<1x8xf32>
    %503 = arith.addf %502, %15 : vector<1x8xf32>
    %504 = vector.extract_strided_slice %453 {offsets = [0, 256], sizes = [1, 8], strides = [1, 1]} : vector<1x384xf32> to vector<1x8xf32>
    %505 = arith.addf %504, %16 : vector<1x8xf32>
    %506 = arith.mulf %492, %505 : vector<1x8xf32>
    %507 = arith.addf %503, %506 : vector<1x8xf32>
    %508 = math.tanh %507 : vector<1x8xf32>
    %cst_109 = arith.constant 1.000000e+00 : f32
    %509 = vector.broadcast %cst_109 : f32 to vector<1x8xf32>
    %510 = arith.subf %509, %501 : vector<1x8xf32>
    %511 = arith.mulf %510, %508 : vector<1x8xf32>
    %512 = arith.mulf %501, %451 : vector<1x8xf32>
    %513 = arith.addf %511, %512 : vector<1x8xf32>
    %c7_110 = arith.constant 7 : index
    %c0_111 = arith.constant 0 : index
    %514 = vector.load %arg4[%c7_110, %c0_111] : memref<8x8xf32, #tpu.memory_space<vmem>>, vector<1x8xf32>
    tpu.vector_store %arg4[%c7_110, %c0_111], %513 {strides = array<i32>} : memref<8x8xf32, #tpu.memory_space<vmem>>, vector<1x8xf32>,
    %c40 = arith.constant 40 : index
    %c0_112 = arith.constant 0 : index
    %515 = vector.load %arg1[%c40, %c0_112] : memref<48x384xf32, #tpu.memory_space<vmem>>, vector<8x4xf32>
    %c37 = arith.constant 37 : index
    %c0_113 = arith.constant 0 : index
    %516 = vector.load %arg1[%c37, %c0_113] : memref<48x384xf32, #tpu.memory_space<vmem>>, vector<1x4xf32>
    %c0_114 = arith.constant 0 : index
    %c0_115 = arith.constant 0 : index
    %517 = vector.load %arg4[%c0_114, %c0_115] : memref<8x8xf32, #tpu.memory_space<vmem>>, vector<8x8xf32>
    %cst_116 = arith.constant dense<0.000000e+00> : vector<8x4xf32>
    %518 = tpu.matmul %517, %515, %cst_116 {dimension_numbers = #tpu.dot_dimension_numbers<[1], [0], [0], [1], [0, 0, 1, 1], [], []>} : vector<8x8xf32>, vector<8x4xf32>, vector<8x4xf32> -> vector<8x4xf32>
    %519 = vector.broadcast %516 : vector<1x4xf32> to vector<8x4xf32>
    %520 = arith.addf %518, %519 : vector<8x4xf32>
    %cst_117 = arith.constant 0.000000e+00 : f32
    %521 = vector.broadcast %cst_117 : f32 to vector<8x4xf32>
    %522 = arith.maximumf %520, %521 : vector<8x4xf32>
    %c0_118 = arith.constant 0 : index
    %c0_119 = arith.constant 0 : index
    %523 = vector.load %arg2[%c0_118, %c0_119] : memref<8x4xf32, #tpu.memory_space<vmem>>, vector<8x4xf32>
    tpu.vector_store %arg2[%c0_118, %c0_119], %522 {strides = array<i32>} : memref<8x4xf32, #tpu.memory_space<vmem>>, vector<8x4xf32>,
    return
  }
}

</mosaic_0001>

<bundles_post_ra>
// kernel: model_forward.1
= control target key start
LH: loop header
LB: loop body
LE: loop exit
PB: predicated region body
PF: predicated region fallthrough
CT: control target
= control target key end

     0   :  { %7 = vsyncpa [#allocation5], 0  ;;  %s4638_s9 = smov [#allocation4]   ;;  %s5087_s0 = inlined_call_operand.vmem [shape: s32[8,1], index: 0, kind: input, shape index: {}]   ;;  %s5088_s1 = inlined_call_operand.hbm [shape: f32[48,384], index: 1, kind: input, shape index: {}]   ;;  %s5089_s2 = inlined_call_operand.vmem [shape: f32[8,4], index: 2, kind: output, shape index: {}]  }
   0x1   :  { %s15_s10 = sshll.u32 %s4638_s9, 4  ;;  %s4614_s13 = scalar_lea.hbm %s5088_s1, 2304  ;;  %s16_s10 = int_to_ptr.vmem [resolvable:$true] %s15_s10 }
   0x2   :  { %p4615_p0 = scmp.ne.s32.totalorder %s5088_s1, %s4614_s13  ;;  %p4618_p1 = scmp.lt.u32.totalorder %s4614_s13, %s5088_s1 }
   0x4   :  { %p4620_p2 = pnand %p4618_p1, %p4615_p0 }
   0x6   :  { %4623 = shalt.err (!%p4620_p2)
}
   0x7   :  { %s4624_s18 = scalar_lea.vmem %s16_s10, 2304  ;;  %p4629_p4 = scmp.lt.s32.totalorder %s16_s10, %s16_s10 }
   0x8   :  { %p4625_p3 = scmp.ne.s32.totalorder %s16_s10, %s4624_s18  ;;  %p4630_p5 = scmp.lt.s32.totalorder %s4624_s18, %s4624_s18 }
   0xa   :  { %p4631_p6 = por %p4630_p5, %p4629_p4 }
   0xc   :  { %p4632_p7 = pnand %p4631_p6, %p4625_p3 }
   0xe   :  { %4635 = shalt.err (!%p4632_p7)
}
   0xf   :  { %s4639_s19 = smov 384   ;;  %s4640_s20 = smov 24  }
  0x10   :  { %21 = dma.hbm_to_vmem [thread:$0]  %s5088_s1, 2304, %s16_s10, [#allocation5], %s4639_s19, %s4639_s19, %s4640_s20  }
  0x11   :  { %4636 = dma.done.wait [#allocation5], 2304  }
  0x12   :  { %4637 = vsyncadd [#allocation5], 4294964992  ;;  %v4641_v0 = vmov 0   ;;  %v4642_v1 = vmov 0.0   ;;  %v25_v2 = vld [vmem:[%s5087_s0] sm:$0xff]  ;;  %v35_v3 = vld [vmem:[#allocation4 + $0x8] sm:$0xff]  ;;  %v26_v7 = vlaneseq }
  0x13   :  { %4439 = vset.pattern.permute.xlu0 %v4641_v0  ;;  %4287 = vmatprep.subr.mxu1 %v4642_v1  ;;  %v34_v4 = vld [vmem:[#allocation4] sm:$0xff]  ;;  %v36_v5 = vld [vmem:[#allocation4 + $0x10] sm:$0xff]  ;;  %vm4643_vm0 = vmmov 0   ;;  %vm37_vm1 = vcmask 64512   ;;  %v4682_v10 = vld [vmem:[#allocation4 + $0x48] sm:$0xff]  ;;  %vm681_vm3 = vcmask 57344  }
  0x14   :  { %105 = vmatprep.mubr.f32.mxu0 %v4642_v1  ;;  %29 = vperm.xlu0 %4439, %v25_v2   ;;  %v4678_v6 = vld [vmem:[#allocation4 + $0x50] sm:$0xff]  ;;  %v27_v8 = vand.u32 127, %v26_v7  ;;  %v4685_v12 = vld [vmem:[#allocation4 + $0x20] sm:$0xff]  ;;  %v4687_v13 = vld [vmem:[#allocation4 + $0x58] sm:$0xff]  ;;  %vm4148_vm4 = vcmask 31744  }
  0x15   :  { %41 = vmatprep.subr.mxu0 %v35_v3  ;;  %4288 = vmatpush3.msra.mxu1 %v36_v5  ;;  %v4694_v14 = vld [vmem:[#allocation4 + $0x18] sm:$0xff]  ;;  %v4700_v15 = vld [vmem:[#allocation4 + $0x28] sm:$0xff]  ;;  %v4717_v17 = vld [vmem:[#allocation4 + $0x30] sm:$0xff] }
  0x16   :  { %42 = vmatpush1.msra.mxu0 %v34_v4  ;;  %4289 = vmatprep.mubr.msk.f32.mxu1 %vm4643_vm0, %v4642_v1  ;;  %v4715_v16 = vld [vmem:[#allocation4 + $0x38] sm:$0xff]  ;;  %v4719_v18 = vld [vmem:[#allocation4 + $0x40] sm:$0xff] }
  0x17   :  { %4292 = vmatprep.subr.mxu1 %v4642_v1  ;;  %202 = vmatprep.subr.mxu0 %v4678_v6  ;;  %v4726_v38 = vld [vmem:[#allocation4 + $0x60] ss:$0 sm:$0xff]  ;;  %v4742_v51 = vld [vmem:[#allocation4 + $0x61] ss:$0 sm:$0xff]  ;;  %v4745_v55 = vld [vmem:[#allocation4 + $0x62] ss:$0 sm:$0xff] }
  0x18   :  { %v4748_v0 = vld [vmem:[#allocation4 + $0x64] ss:$0 sm:$0xff]  ;;  %v4750_v3 = vld [vmem:[#allocation4 + $0x63] ss:$0 sm:$0xff] }
  0x93   :  { %v30_v9 = vpop.permute.xlu0 %29 }
  0x94   :  { %vm31_vm2 = vcmp.eq.s32.totalorder %v27_v8, %v30_v9 }
  0x95   :  { %v4155_v11 = vsel %vm31_vm2, 1.0, %v4642_v1 }
  0x96   :  { %4156 = vmatmul.mubr.msk.f32.vlgmr.msra.gmra.mrb[0].mxu0 %vm37_vm1, %v4155_v11  ;;  %4290 = vmatmul.mubr.msk.f32.vlgmr.msra.gmra.mrb[0].mxu1 %vm37_vm1, %v4155_v11 }
  0x97   :  { %203 = vmatpush1.msra.mxu0 %v4682_v10  ;;  %266 = vmatprep.mubr.f32.mxu0 %v4642_v1 }
  0x98   :  { %343 = vmatprep.subr.mxu0 %v4685_v12  ;;  %4293 = vmatpush3.msra.mxu1 %v4687_v13 }
  0x99   :  { %4294 = vmatprep.mubr.msk.f32.mxu1 %vm4643_vm0, %v4642_v1  ;;  %4297 = vmatprep.subr.mxu1 %v4642_v1 }
  0x9a   :  { %267 = vmatmul.mubr.f32.vlgmr.msra.gmra.mrb[2].mxu0 %v4642_v1  ;;  %4295 = vmatmul.mubr.f32.vlgmr.msra.gmra.mrb[2].mxu1 %v4642_v1 }
  0x9b   :  { %344 = vmatpush1.msra.mxu0 %v4694_v14  ;;  %407 = vmatprep.mubr.f32.mxu0 %v4642_v1 }
  0x9c   :  { %4298 = vmatpush3.msra.mxu1 %v4700_v15  ;;  %4299 = vmatprep.mubr.msk.f32.mxu1 %vm4643_vm0, %v4642_v1 }
  0x9d   :  { %4302 = vmatprep.subr.mxu1 %v4642_v1  ;;  %515 = vmatprep.subr.mxu0 %v4715_v16 }
  0x9e   :  { %408 = vmatmul.mubr.f32.vlgmr.msra.gmra.mrb[4].mxu0 %v4642_v1  ;;  %4300 = vmatmul.mubr.f32.vlgmr.msra.gmra.mrb[4].mxu1 %v4642_v1 }
  0x9f   :  { %579 = vmatprep.mubr.f32.mxu0 %v4642_v1  ;;  %4304 = vmatprep.mubr.msk.f32.mxu1 %vm4643_vm0, %v4642_v1 }
  0xa0   :  { %4303 = vmatpush3.msra.mxu1 %v4719_v18  ;;  %516 = vmatpush1.msra.mxu0 %v4717_v17 }
  0xa1   :  { %4307 = vmatprep.subr.mxu1 %v4642_v1  ;;  %686 = vmatprep.subr.mxu0 %v4678_v6 }
 0x169   :  { %v107_v19 = vpop.f32.mrb[0].mxu0  ;;  %v178_v20 = vpop.f32.mrb[0].mxu1 }
 0x16a   :  { %182 = vst [vmem:[#allocation2] sm:$0xff] %v107_v19  ;;  %184 = vst [vmem:[#allocation2 + $0x10] sm:$0xff] %v178_v20  ;;  %v109_v21 = vpop.f32.mrb[1].mxu0  ;;  %v4291_v22 = vpop.f32.mrb[1].mxu1 }
 0x16b   :  { %183 = vst [vmem:[#allocation2 + $0x8] sm:$0xff] %v109_v21 }
 0x16d   :  { %v339_v23 = vpop.f32.mrb[2].mxu1 }
 0x16e   :  { %v4296_v24 = vpop.f32.mrb[3].mxu1  ;;  %v673_v4 = vadd.f32 %v339_v23, %v4748_v0 }
 0x171   :  { %v409_v25 = vpop.f32.mrb[4].mxu0  ;;  %v480_v26 = vpop.f32.mrb[4].mxu1 }
 0x172   :  { %v484_v27 = vld [vmem:[#allocation2] ss:$8 sm:$0x7]  ;;  %v411_v28 = vpop.f32.mrb[5].mxu0  ;;  %v4301_v29 = vpop.f32.mrb[5].mxu1  ;;  %v502_v40 = vadd.f32 %v480_v26, %v4726_v38 }
 0x173   :  { %v485_v30 = vadd.f32 %v484_v27, %v409_v25  ;;  %v493_v31 = vrot.slane %v484_v27, 1  ;;  %v504_v42 = vrot.slane %v484_v27, 2  ;;  %v969_v26 = vld [vmem:[#allocation2 + $0x1] ss:$8 sm:$0x7] }
 0x175   :  { %v4158_v32 = vmul.f32 -1.442695, %v485_v30  ;;  %v495_v33 = vadd.f32 %v493_v31, %v411_v28 }
 0x177   :  { %4440 = vpow2.f32 %v4158_v32  ;;  %v4159_v34 = vmul.f32 -1.442695, %v495_v33  ;;  %v978_v32 = vrot.slane %v969_v26, 1 }
 0x179   :  { %4442 = vpow2.f32 %v4159_v34 }
 0x181   :  { %v4441_v35 = vpop.eup %4440 }
 0x182   :  { %v489_v36 = vadd.f32 1.0, %v4441_v35 }
 0x183   :  { %v4443_v37 = vpop.eup %4442 }
 0x184   :  { %4444 = vrcp.f32 %v489_v36  ;;  %v499_v39 = vadd.f32 1.0, %v4443_v37 }
 0x186   :  { %4446 = vrcp.f32 %v499_v39 }
 0x18e   :  { %v4445_v41 = vpop.eup %4444 }
 0x18f   :  { %v503_v43 = vmul.f32 %v4445_v41, %v502_v40 }
 0x190   :  { %v4447_v45 = vpop.eup %4446 }
 0x191   :  { %v506_v44 = vadd.f32 %v504_v42, %v503_v43  ;;  %v508_v46 = vsub.f32 1.0, %v4447_v45  ;;  %v510_v49 = vmul.f32 0.0, %v4447_v45  ;;  %v989_v43 = vrot.slane %v969_v26, 2 }
 0x193   :  { %4448 = vtanh.f32 %v506_v44 }
 0x19d   :  { %v4449_v47 = vpop.eup %4448 }
 0x19e   :  { %v509_v48 = vmul.f32 %v4449_v47, %v508_v46 }
 0x1a0   :  { %v4729_v50 = vadd.f32 %v510_v49, %v509_v48 }
 0x1a2   :  { %4160 = vmatmul.mubr.msk.f32.vlgmr.msra.gmra.mrb[2].mxu0 %vm37_vm1, %v4729_v50  ;;  %4305 = vmatmul.mubr.msk.f32.vlgmr.msra.gmra.mrb[6].mxu1 %vm37_vm1, %v4729_v50 }
 0x1a3   :  { %687 = vmatpush1.msra.mxu0 %v4682_v10  ;;  %750 = vmatprep.mubr.f32.mxu0 %v4642_v1 }
 0x1a4   :  { %4308 = vmatpush3.msra.mxu1 %v4687_v13  ;;  %4309 = vmatprep.mubr.msk.f32.mxu1 %vm4643_vm0, %v4642_v1 }
 0x1a5   :  { %827 = vmatprep.subr.mxu0 %v4685_v12  ;;  %4312 = vmatprep.subr.mxu1 %v4642_v1 }
 0x275   :  { %v581_v52 = vpop.f32.mrb[2].mxu0  ;;  %v652_v53 = vpop.f32.mrb[6].mxu1 }
 0x276   :  { %v657_v54 = vadd.f32 %v581_v52, %v4742_v51  ;;  %v583_v56 = vpop.f32.mrb[3].mxu0  ;;  %v4306_v57 = vpop.f32.mrb[7].mxu1  ;;  %v672_v7 = vadd.f32 %v652_v53, %v4750_v3 }
 0x277   :  { %v665_v59 = vadd.f32 %v583_v56, %v4745_v55 }
 0x278   :  { %v4162_v58 = vmul.f32 -1.442695, %v657_v54 }
 0x279   :  { %v4163_v60 = vmul.f32 -1.442695, %v665_v59 }
 0x27a   :  { %4450 = vpow2.f32 %v4162_v58 }
 0x27b   :  { %4452 = vpow2.f32 %v4163_v60 }
 0x284   :  { %v4451_v61 = vpop.eup %4450 }
 0x285   :  { %v661_v62 = vadd.f32 1.0, %v4451_v61  ;;  %v4453_v63 = vpop.eup %4452 }
 0x286   :  { %v669_v2 = vadd.f32 1.0, %v4453_v63 }
 0x287   :  { %4454 = vrcp.f32 %v661_v62 }
 0x288   :  { %4456 = vrcp.f32 %v669_v2 }
 0x291   :  { %v4455_v5 = vpop.eup %4454 }
 0x292   :  { %v674_v8 = vmul.f32 %v4455_v5, %v673_v4  ;;  %v4457_v11 = vpop.eup %4456 }
 0x293   :  { %v677_v19 = vsub.f32 1.0, %v4457_v11  ;;  %v679_v22 = vmul.f32 0.0, %v4457_v11 }
 0x294   :  { %v675_v9 = vadd.f32 %v674_v8, %v672_v7 }
 0x296   :  { %4458 = vtanh.f32 %v675_v9 }
 0x2a0   :  { %v4459_v20 = vpop.eup %4458 }
 0x2a1   :  { %v678_v21 = vmul.f32 %v4459_v20, %v677_v19 }
 0x2a3   :  { %v4754_v24 = vadd.f32 %v679_v22, %v678_v21 }
 0x2a5   :  { %682 = vst.msk [vmem:[#allocation3] sm:$0x1] %vm681_vm3, %v4754_v24  ;;  %4164 = vmatmul.mubr.msk.f32.vlgmr.msra.gmra.mrb[6].mxu0 %vm37_vm1, %v4754_v24  ;;  %4310 = vmatmul.mubr.msk.f32.vlgmr.msra.gmra.mrb[8].mxu1 %vm37_vm1, %v4754_v24 }
 0x2a6   :  { %828 = vmatpush1.msra.mxu0 %v4694_v14  ;;  %891 = vmatprep.mubr.f32.mxu0 %v4642_v1 }
 0x2a7   :  { %4313 = vmatpush3.msra.mxu1 %v4700_v15  ;;  %4314 = vmatprep.mubr.msk.f32.mxu1 %vm4643_vm0, %v4642_v1 }
 0x2a8   :  { %1000 = vmatprep.subr.mxu0 %v4715_v16  ;;  %4317 = vmatprep.subr.mxu1 %v4642_v1 }
 0x2a9   :  { %4166 = vmatmul.mubr.msk.f32.vlgmr.msra.gmra.mrb[8].mxu0 %vm37_vm1, %v4729_v50  ;;  %4315 = vmatmul.mubr.msk.f32.vlgmr.msra.gmra.mrb[10].mxu1 %vm37_vm1, %v4729_v50 }
 0x2aa   :  { %1001 = vmatpush1.msra.mxu0 %v4717_v17  ;;  %1064 = vmatprep.mubr.f32.mxu0 %v4642_v1 }
 0x2ab   :  { %4318 = vmatpush3.msra.mxu1 %v4719_v18  ;;  %4319 = vmatprep.mubr.msk.f32.mxu1 %vm4643_vm0, %v4642_v1 }
 0x2ac   :  { %1170 = vmatprep.subr.mxu0 %v4678_v6  ;;  %4322 = vmatprep.subr.mxu1 %v4642_v1 }
 0x378   :  { %v823_v23 = vpop.f32.mrb[8].mxu1 }
 0x379   :  { %v4311_v25 = vpop.f32.mrb[9].mxu1  ;;  %v1158_v5 = vadd.f32 %v823_v23, %v4748_v0 }
 0x37c   :  { %v893_v27 = vpop.f32.mrb[8].mxu0  ;;  %v964_v28 = vpop.f32.mrb[10].mxu1 }
 0x37d   :  { %v970_v29 = vadd.f32 %v969_v26, %v893_v27  ;;  %v895_v30 = vpop.f32.mrb[9].mxu0  ;;  %v4316_v31 = vpop.f32.mrb[11].mxu1  ;;  %v987_v41 = vadd.f32 %v964_v28, %v4726_v38  ;;  %v1453_v27 = vld [vmem:[#allocation2 + $0x2] ss:$8 sm:$0x7] }
 0x37e   :  { %v980_v34 = vadd.f32 %v978_v32, %v895_v30 }
 0x37f   :  { %v4168_v33 = vmul.f32 -1.442695, %v970_v29 }
 0x380   :  { %v4169_v35 = vmul.f32 -1.442695, %v980_v34 }
 0x381   :  { %4460 = vpow2.f32 %v4168_v33  ;;  %v1462_v33 = vrot.slane %v1453_v27, 1 }
 0x382   :  { %4462 = vpow2.f32 %v4169_v35 }
 0x38b   :  { %v4461_v36 = vpop.eup %4460 }
 0x38c   :  { %v974_v37 = vadd.f32 1.0, %v4461_v36  ;;  %v4463_v39 = vpop.eup %4462 }
 0x38d   :  { %v984_v40 = vadd.f32 1.0, %v4463_v39 }
 0x38e   :  { %4464 = vrcp.f32 %v974_v37 }
 0x38f   :  { %4466 = vrcp.f32 %v984_v40 }
 0x398   :  { %v4465_v42 = vpop.eup %4464 }
 0x399   :  { %v988_v44 = vmul.f32 %v4465_v42, %v987_v41  ;;  %v4467_v46 = vpop.eup %4466 }
 0x39a   :  { %v993_v47 = vsub.f32 1.0, %v4467_v46  ;;  %v995_v52 = vmul.f32 %v4467_v46, %v4729_v50 }
 0x39b   :  { %v991_v45 = vadd.f32 %v989_v43, %v988_v44  ;;  %v1473_v44 = vrot.slane %v1453_v27, 2 }
 0x39d   :  { %4468 = vtanh.f32 %v991_v45 }
 0x3a7   :  { %v4469_v48 = vpop.eup %4468 }
 0x3a8   :  { %v994_v49 = vmul.f32 %v4469_v48, %v993_v47 }
 0x3aa   :  { %v4782_v53 = vadd.f32 %v995_v52, %v994_v49 }
 0x3ac   :  { %4170 = vmatmul.mubr.msk.f32.vlgmr.msra.gmra.mrb[6].mxu0 %vm37_vm1, %v4782_v53  ;;  %4320 = vmatmul.mubr.msk.f32.vlgmr.msra.gmra.mrb[12].mxu1 %vm37_vm1, %v4782_v53 }
 0x3ad   :  { %1171 = vmatpush1.msra.mxu0 %v4682_v10  ;;  %1234 = vmatprep.mubr.f32.mxu0 %v4642_v1 }
 0x3ae   :  { %4323 = vmatpush3.msra.mxu1 %v4687_v13  ;;  %4324 = vmatprep.mubr.msk.f32.mxu1 %vm4643_vm0, %v4642_v1 }
 0x3af   :  { %1311 = vmatprep.subr.mxu0 %v4685_v12  ;;  %4327 = vmatprep.subr.mxu1 %v4642_v1 }
 0x47f   :  { %v1066_v50 = vpop.f32.mrb[6].mxu0  ;;  %v1137_v54 = vpop.f32.mrb[12].mxu1 }
 0x480   :  { %v1142_v56 = vadd.f32 %v1066_v50, %v4742_v51  ;;  %v1068_v57 = vpop.f32.mrb[7].mxu0  ;;  %v4321_v58 = vpop.f32.mrb[13].mxu1  ;;  %v1157_v8 = vadd.f32 %v1137_v54, %v4750_v3 }
 0x481   :  { %v1150_v60 = vadd.f32 %v1068_v57, %v4745_v55 }
 0x482   :  { %v4172_v59 = vmul.f32 -1.442695, %v1142_v56 }
 0x483   :  { %v4173_v61 = vmul.f32 -1.442695, %v1150_v60 }
 0x484   :  { %4470 = vpow2.f32 %v4172_v59 }
 0x485   :  { %4472 = vpow2.f32 %v4173_v61 }
 0x48e   :  { %v4471_v62 = vpop.eup %4470 }
 0x48f   :  { %v1146_v63 = vadd.f32 1.0, %v4471_v62  ;;  %v4473_v2 = vpop.eup %4472 }
 0x490   :  { %v1154_v4 = vadd.f32 1.0, %v4473_v2 }
 0x491   :  { %4474 = vrcp.f32 %v1146_v63 }
 0x492   :  { %4476 = vrcp.f32 %v1154_v4 }
 0x49b   :  { %v4475_v7 = vpop.eup %4474 }
 0x49c   :  { %v1159_v9 = vmul.f32 %v4475_v7, %v1158_v5  ;;  %v4477_v19 = vpop.eup %4476 }
 0x49d   :  { %v1162_v20 = vsub.f32 1.0, %v4477_v19  ;;  %v1164_v25 = vmul.f32 %v4477_v19, %v4754_v24 }
 0x49e   :  { %v1160_v11 = vadd.f32 %v1159_v9, %v1157_v8 }
 0x4a0   :  { %4478 = vtanh.f32 %v1160_v11 }
 0x4aa   :  { %v4479_v21 = vpop.eup %4478 }
 0x4ab   :  { %v1163_v22 = vmul.f32 %v4479_v21, %v1162_v20 }
 0x4ad   :  { %v4800_v26 = vadd.f32 %v1164_v25, %v1163_v22 }
 0x4af   :  { %1166 = vst.msk [vmem:[#allocation3 + $0x1] sm:$0x1] %vm681_vm3, %v4800_v26  ;;  %4174 = vmatmul.mubr.msk.f32.vlgmr.msra.gmra.mrb[10].mxu0 %vm37_vm1, %v4800_v26  ;;  %4325 = vmatmul.mubr.msk.f32.vlgmr.msra.gmra.mrb[14].mxu1 %vm37_vm1, %v4800_v26 }
 0x4b0   :  { %1312 = vmatpush1.msra.mxu0 %v4694_v14  ;;  %1375 = vmatprep.mubr.f32.mxu0 %v4642_v1 }
 0x4b1   :  { %4328 = vmatpush3.msra.mxu1 %v4700_v15  ;;  %4329 = vmatprep.mubr.msk.f32.mxu1 %vm4643_vm0, %v4642_v1 }
 0x4b2   :  { %1484 = vmatprep.subr.mxu0 %v4715_v16  ;;  %4332 = vmatprep.subr.mxu1 %v4642_v1 }
 0x4b3   :  { %4176 = vmatmul.mubr.msk.f32.vlgmr.msra.gmra.mrb[12].mxu0 %vm37_vm1, %v4782_v53  ;;  %4330 = vmatmul.mubr.msk.f32.vlgmr.msra.gmra.mrb[16].mxu1 %vm37_vm1, %v4782_v53 }
 0x4b4   :  { %1485 = vmatpush1.msra.mxu0 %v4717_v17  ;;  %1548 = vmatprep.mubr.f32.mxu0 %v4642_v1 }
 0x4b5   :  { %4333 = vmatpush3.msra.mxu1 %v4719_v18  ;;  %4334 = vmatprep.mubr.msk.f32.mxu1 %vm4643_vm0, %v4642_v1 }
 0x4b6   :  { %1654 = vmatprep.subr.mxu0 %v4678_v6  ;;  %4337 = vmatprep.subr.mxu1 %v4642_v1 }
 0x582   :  { %v1307_v24 = vpop.f32.mrb[14].mxu1 }
 0x583   :  { %v4326_v23 = vpop.f32.mrb[15].mxu1  ;;  %v1642_v7 = vadd.f32 %v1307_v24, %v4748_v0 }
 0x586   :  { %v1377_v28 = vpop.f32.mrb[12].mxu0  ;;  %v1448_v29 = vpop.f32.mrb[16].mxu1 }
 0x587   :  { %v1454_v30 = vadd.f32 %v1453_v27, %v1377_v28  ;;  %v1379_v31 = vpop.f32.mrb[13].mxu0  ;;  %v4331_v32 = vpop.f32.mrb[17].mxu1  ;;  %v1471_v42 = vadd.f32 %v1448_v29, %v4726_v38  ;;  %v1937_v28 = vld [vmem:[#allocation2 + $0x3] ss:$8 sm:$0x7] }
 0x588   :  { %v1464_v35 = vadd.f32 %v1462_v33, %v1379_v31 }
 0x589   :  { %v4178_v34 = vmul.f32 -1.442695, %v1454_v30 }
 0x58a   :  { %v4179_v36 = vmul.f32 -1.442695, %v1464_v35 }
 0x58b   :  { %4480 = vpow2.f32 %v4178_v34  ;;  %v1946_v34 = vrot.slane %v1937_v28, 1 }
 0x58c   :  { %4482 = vpow2.f32 %v4179_v36 }
 0x595   :  { %v4481_v37 = vpop.eup %4480 }
 0x596   :  { %v1458_v39 = vadd.f32 1.0, %v4481_v37  ;;  %v4483_v40 = vpop.eup %4482 }
 0x597   :  { %v1468_v41 = vadd.f32 1.0, %v4483_v40 }
 0x598   :  { %4484 = vrcp.f32 %v1458_v39 }
 0x599   :  { %4486 = vrcp.f32 %v1468_v41 }
 0x5a2   :  { %v4485_v43 = vpop.eup %4484 }
 0x5a3   :  { %v1472_v45 = vmul.f32 %v4485_v43, %v1471_v42  ;;  %v4487_v47 = vpop.eup %4486 }
 0x5a4   :  { %v1477_v48 = vsub.f32 1.0, %v4487_v47  ;;  %v1479_v50 = vmul.f32 %v4487_v47, %v4782_v53 }
 0x5a5   :  { %v1475_v46 = vadd.f32 %v1473_v44, %v1472_v45  ;;  %v1957_v45 = vrot.slane %v1937_v28, 2 }
 0x5a7   :  { %4488 = vtanh.f32 %v1475_v46 }
 0x5b1   :  { %v4489_v49 = vpop.eup %4488 }
 0x5b2   :  { %v1478_v52 = vmul.f32 %v4489_v49, %v1477_v48 }
 0x5b4   :  { %v4828_v54 = vadd.f32 %v1479_v50, %v1478_v52 }
 0x5b6   :  { %4180 = vmatmul.mubr.msk.f32.vlgmr.msra.gmra.mrb[10].mxu0 %vm37_vm1, %v4828_v54  ;;  %4335 = vmatmul.mubr.msk.f32.vlgmr.msra.gmra.mrb[18].mxu1 %vm37_vm1, %v4828_v54 }
 0x5b7   :  { %1655 = vmatpush1.msra.mxu0 %v4682_v10  ;;  %1718 = vmatprep.mubr.f32.mxu0 %v4642_v1 }
 0x5b8   :  { %4338 = vmatpush3.msra.mxu1 %v4687_v13  ;;  %4339 = vmatprep.mubr.msk.f32.mxu1 %vm4643_vm0, %v4642_v1 }
 0x5b9   :  { %1795 = vmatprep.subr.mxu0 %v4685_v12  ;;  %4342 = vmatprep.subr.mxu1 %v4642_v1 }
 0x689   :  { %v1550_v53 = vpop.f32.mrb[10].mxu0  ;;  %v1621_v56 = vpop.f32.mrb[18].mxu1 }
 0x68a   :  { %v1626_v57 = vadd.f32 %v1550_v53, %v4742_v51  ;;  %v1552_v58 = vpop.f32.mrb[11].mxu0  ;;  %v4336_v59 = vpop.f32.mrb[19].mxu1  ;;  %v1641_v9 = vadd.f32 %v1621_v56, %v4750_v3 }
 0x68b   :  { %v1634_v61 = vadd.f32 %v1552_v58, %v4745_v55 }
 0x68c   :  { %v4182_v60 = vmul.f32 -1.442695, %v1626_v57 }
 0x68d   :  { %v4183_v62 = vmul.f32 -1.442695, %v1634_v61 }
 0x68e   :  { %4490 = vpow2.f32 %v4182_v60 }
 0x68f   :  { %4492 = vpow2.f32 %v4183_v62 }
 0x698   :  { %v4491_v63 = vpop.eup %4490 }
 0x699   :  { %v1630_v2 = vadd.f32 1.0, %v4491_v63  ;;  %v4493_v4 = vpop.eup %4492 }
 0x69a   :  { %v1638_v5 = vadd.f32 1.0, %v4493_v4 }
 0x69b   :  { %4494 = vrcp.f32 %v1630_v2 }
 0x69c   :  { %4496 = vrcp.f32 %v1638_v5 }
 0x6a5   :  { %v4495_v8 = vpop.eup %4494 }
 0x6a6   :  { %v1643_v11 = vmul.f32 %v4495_v8, %v1642_v7  ;;  %v4497_v20 = vpop.eup %4496 }
 0x6a7   :  { %v1646_v21 = vsub.f32 1.0, %v4497_v20  ;;  %v1648_v23 = vmul.f32 %v4497_v20, %v4800_v26 }
 0x6a8   :  { %v1644_v19 = vadd.f32 %v1643_v11, %v1641_v9 }
 0x6aa   :  { %4498 = vtanh.f32 %v1644_v19 }
 0x6b4   :  { %v4499_v22 = vpop.eup %4498 }
 0x6b5   :  { %v1647_v25 = vmul.f32 %v4499_v22, %v1646_v21 }
 0x6b7   :  { %v4846_v27 = vadd.f32 %v1648_v23, %v1647_v25 }
 0x6b9   :  { %1650 = vst.msk [vmem:[#allocation3 + $0x2] sm:$0x1] %vm681_vm3, %v4846_v27  ;;  %4184 = vmatmul.mubr.msk.f32.vlgmr.msra.gmra.mrb[14].mxu0 %vm37_vm1, %v4846_v27  ;;  %4340 = vmatmul.mubr.msk.f32.vlgmr.msra.gmra.mrb[20].mxu1 %vm37_vm1, %v4846_v27 }
 0x6ba   :  { %1796 = vmatpush1.msra.mxu0 %v4694_v14  ;;  %1859 = vmatprep.mubr.f32.mxu0 %v4642_v1 }
 0x6bb   :  { %4343 = vmatpush3.msra.mxu1 %v4700_v15  ;;  %4344 = vmatprep.mubr.msk.f32.mxu1 %vm4643_vm0, %v4642_v1 }
 0x6bc   :  { %1968 = vmatprep.subr.mxu0 %v4715_v16  ;;  %4347 = vmatprep.subr.mxu1 %v4642_v1 }
 0x6bd   :  { %4186 = vmatmul.mubr.msk.f32.vlgmr.msra.gmra.mrb[16].mxu0 %vm37_vm1, %v4828_v54  ;;  %4345 = vmatmul.mubr.msk.f32.vlgmr.msra.gmra.mrb[22].mxu1 %vm37_vm1, %v4828_v54 }
 0x6be   :  { %1969 = vmatpush1.msra.mxu0 %v4717_v17  ;;  %2032 = vmatprep.mubr.f32.mxu0 %v4642_v1 }
 0x6bf   :  { %4348 = vmatpush3.msra.mxu1 %v4719_v18  ;;  %4349 = vmatprep.mubr.msk.f32.mxu1 %vm4643_vm0, %v4642_v1 }
 0x6c0   :  { %2138 = vmatprep.subr.mxu0 %v4678_v6  ;;  %4352 = vmatprep.subr.mxu1 %v4642_v1 }
 0x78c   :  { %v1791_v26 = vpop.f32.mrb[20].mxu1 }
 0x78d   :  { %v4341_v24 = vpop.f32.mrb[21].mxu1  ;;  %v2126_v8 = vadd.f32 %v1791_v26, %v4748_v0 }
 0x790   :  { %v1861_v29 = vpop.f32.mrb[16].mxu0  ;;  %v1932_v30 = vpop.f32.mrb[22].mxu1 }
 0x791   :  { %v1938_v31 = vadd.f32 %v1937_v28, %v1861_v29  ;;  %v1863_v32 = vpop.f32.mrb[17].mxu0  ;;  %v4346_v33 = vpop.f32.mrb[23].mxu1  ;;  %v1955_v43 = vadd.f32 %v1932_v30, %v4726_v38  ;;  %v2421_v29 = vld [vmem:[#allocation2 + $0x4] ss:$8 sm:$0x7] }
 0x792   :  { %v1948_v36 = vadd.f32 %v1946_v34, %v1863_v32 }
 0x793   :  { %v4188_v35 = vmul.f32 -1.442695, %v1938_v31 }
 0x794   :  { %v4189_v37 = vmul.f32 -1.442695, %v1948_v36 }
 0x795   :  { %4500 = vpow2.f32 %v4188_v35  ;;  %v2430_v35 = vrot.slane %v2421_v29, 1 }
 0x796   :  { %4502 = vpow2.f32 %v4189_v37 }
 0x79f   :  { %v4501_v39 = vpop.eup %4500 }
 0x7a0   :  { %v1942_v40 = vadd.f32 1.0, %v4501_v39  ;;  %v4503_v41 = vpop.eup %4502 }
 0x7a1   :  { %v1952_v42 = vadd.f32 1.0, %v4503_v41 }
 0x7a2   :  { %4504 = vrcp.f32 %v1942_v40 }
 0x7a3   :  { %4506 = vrcp.f32 %v1952_v42 }
 0x7ac   :  { %v4505_v44 = vpop.eup %4504 }
 0x7ad   :  { %v1956_v46 = vmul.f32 %v4505_v44, %v1955_v43  ;;  %v4507_v48 = vpop.eup %4506 }
 0x7ae   :  { %v1961_v49 = vsub.f32 1.0, %v4507_v48  ;;  %v1963_v53 = vmul.f32 %v4507_v48, %v4828_v54 }
 0x7af   :  { %v1959_v47 = vadd.f32 %v1957_v45, %v1956_v46  ;;  %v2441_v46 = vrot.slane %v2421_v29, 2 }
 0x7b1   :  { %4508 = vtanh.f32 %v1959_v47 }
 0x7bb   :  { %v4509_v52 = vpop.eup %4508 }
 0x7bc   :  { %v1962_v50 = vmul.f32 %v4509_v52, %v1961_v49 }
 0x7be   :  { %v4874_v56 = vadd.f32 %v1963_v53, %v1962_v50 }
 0x7c0   :  { %4190 = vmatmul.mubr.msk.f32.vlgmr.msra.gmra.mrb[14].mxu0 %vm37_vm1, %v4874_v56  ;;  %4350 = vmatmul.mubr.msk.f32.vlgmr.msra.gmra.mrb[24].mxu1 %vm37_vm1, %v4874_v56 }
 0x7c1   :  { %2139 = vmatpush1.msra.mxu0 %v4682_v10  ;;  %2202 = vmatprep.mubr.f32.mxu0 %v4642_v1 }
 0x7c2   :  { %4353 = vmatpush3.msra.mxu1 %v4687_v13  ;;  %4354 = vmatprep.mubr.msk.f32.mxu1 %vm4643_vm0, %v4642_v1 }
 0x7c3   :  { %2279 = vmatprep.subr.mxu0 %v4685_v12  ;;  %4357 = vmatprep.subr.mxu1 %v4642_v1 }
 0x893   :  { %v2034_v54 = vpop.f32.mrb[14].mxu0  ;;  %v2105_v57 = vpop.f32.mrb[24].mxu1 }
 0x894   :  { %v2110_v58 = vadd.f32 %v2034_v54, %v4742_v51  ;;  %v2036_v59 = vpop.f32.mrb[15].mxu0  ;;  %v4351_v60 = vpop.f32.mrb[25].mxu1  ;;  %v2125_v11 = vadd.f32 %v2105_v57, %v4750_v3 }
 0x895   :  { %v2118_v62 = vadd.f32 %v2036_v59, %v4745_v55 }
 0x896   :  { %v4192_v61 = vmul.f32 -1.442695, %v2110_v58 }
 0x897   :  { %v4193_v63 = vmul.f32 -1.442695, %v2118_v62 }
 0x898   :  { %4510 = vpow2.f32 %v4192_v61 }
 0x899   :  { %4512 = vpow2.f32 %v4193_v63 }
 0x8a2   :  { %v4511_v2 = vpop.eup %4510 }
 0x8a3   :  { %v2114_v4 = vadd.f32 1.0, %v4511_v2  ;;  %v4513_v5 = vpop.eup %4512 }
 0x8a4   :  { %v2122_v7 = vadd.f32 1.0, %v4513_v5 }
 0x8a5   :  { %4514 = vrcp.f32 %v2114_v4 }
 0x8a6   :  { %4516 = vrcp.f32 %v2122_v7 }
 0x8af   :  { %v4515_v9 = vpop.eup %4514 }
 0x8b0   :  { %v2127_v19 = vmul.f32 %v4515_v9, %v2126_v8  ;;  %v4517_v21 = vpop.eup %4516 }
 0x8b1   :  { %v2130_v22 = vsub.f32 1.0, %v4517_v21  ;;  %v2132_v24 = vmul.f32 %v4517_v21, %v4846_v27 }
 0x8b2   :  { %v2128_v20 = vadd.f32 %v2127_v19, %v2125_v11 }
 0x8b4   :  { %4518 = vtanh.f32 %v2128_v20 }
 0x8be   :  { %v4519_v25 = vpop.eup %4518 }
 0x8bf   :  { %v2131_v23 = vmul.f32 %v4519_v25, %v2130_v22 }
 0x8c1   :  { %v4892_v28 = vadd.f32 %v2132_v24, %v2131_v23 }
 0x8c3   :  { %2134 = vst.msk [vmem:[#allocation3 + $0x3] sm:$0x1] %vm681_vm3, %v4892_v28  ;;  %4194 = vmatmul.mubr.msk.f32.vlgmr.msra.gmra.mrb[18].mxu0 %vm37_vm1, %v4892_v28  ;;  %4355 = vmatmul.mubr.msk.f32.vlgmr.msra.gmra.mrb[26].mxu1 %vm37_vm1, %v4892_v28 }
 0x8c4   :  { %2280 = vmatpush1.msra.mxu0 %v4694_v14  ;;  %2343 = vmatprep.mubr.f32.mxu0 %v4642_v1 }
 0x8c5   :  { %4358 = vmatpush3.msra.mxu1 %v4700_v15  ;;  %4359 = vmatprep.mubr.msk.f32.mxu1 %vm4643_vm0, %v4642_v1 }
 0x8c6   :  { %2452 = vmatprep.subr.mxu0 %v4715_v16  ;;  %4362 = vmatprep.subr.mxu1 %v4642_v1 }
 0x8c7   :  { %4196 = vmatmul.mubr.msk.f32.vlgmr.msra.gmra.mrb[20].mxu0 %vm37_vm1, %v4874_v56  ;;  %4360 = vmatmul.mubr.msk.f32.vlgmr.msra.gmra.mrb[28].mxu1 %vm37_vm1, %v4874_v56 }
 0x8c8   :  { %2453 = vmatpush1.msra.mxu0 %v4717_v17  ;;  %2516 = vmatprep.mubr.f32.mxu0 %v4642_v1 }
 0x8c9   :  { %4363 = vmatpush3.msra.mxu1 %v4719_v18  ;;  %4364 = vmatprep.mubr.msk.f32.mxu1 %vm4643_vm0, %v4642_v1 }
 0x8ca   :  { %2622 = vmatprep.subr.mxu0 %v4678_v6  ;;  %4367 = vmatprep.subr.mxu1 %v4642_v1 }
 0x996   :  { %v2275_v27 = vpop.f32.mrb[26].mxu1 }
 0x997   :  { %v4356_v26 = vpop.f32.mrb[27].mxu1  ;;  %v2610_v9 = vadd.f32 %v2275_v27, %v4748_v0 }
 0x99a   :  { %v2345_v30 = vpop.f32.mrb[20].mxu0  ;;  %v2416_v31 = vpop.f32.mrb[28].mxu1 }
 0x99b   :  { %v2422_v32 = vadd.f32 %v2421_v29, %v2345_v30  ;;  %v2347_v33 = vpop.f32.mrb[21].mxu0  ;;  %v4361_v34 = vpop.f32.mrb[29].mxu1  ;;  %v2439_v44 = vadd.f32 %v2416_v31, %v4726_v38 }
 0x99c   :  { %v2432_v37 = vadd.f32 %v2430_v35, %v2347_v33 }
 0x99d   :  { %v4198_v36 = vmul.f32 -1.442695, %v2422_v32 }
 0x99e   :  { %v4199_v39 = vmul.f32 -1.442695, %v2432_v37 }
 0x99f   :  { %4520 = vpow2.f32 %v4198_v36 }
 0x9a0   :  { %4522 = vpow2.f32 %v4199_v39 }
 0x9a9   :  { %v4521_v40 = vpop.eup %4520 }
 0x9aa   :  { %v2426_v41 = vadd.f32 1.0, %v4521_v40  ;;  %v4523_v42 = vpop.eup %4522 }
 0x9ab   :  { %v2436_v43 = vadd.f32 1.0, %v4523_v42 }
 0x9ac   :  { %4524 = vrcp.f32 %v2426_v41 }
 0x9ad   :  { %4526 = vrcp.f32 %v2436_v43 }
 0x9b6   :  { %v4525_v45 = vpop.eup %4524 }
 0x9b7   :  { %v2440_v47 = vmul.f32 %v4525_v45, %v2439_v44  ;;  %v4527_v49 = vpop.eup %4526 }
 0x9b8   :  { %v2445_v52 = vsub.f32 1.0, %v4527_v49  ;;  %v2447_v54 = vmul.f32 %v4527_v49, %v4874_v56 }
 0x9b9   :  { %v2443_v48 = vadd.f32 %v2441_v46, %v2440_v47 }
 0x9bb   :  { %4528 = vtanh.f32 %v2443_v48 }
 0x9c5   :  { %v4529_v50 = vpop.eup %4528 }
 0x9c6   :  { %v2446_v53 = vmul.f32 %v4529_v50, %v2445_v52 }
 0x9c8   :  { %v4920_v57 = vadd.f32 %v2447_v54, %v2446_v53 }
 0x9ca   :  { %4200 = vmatmul.mubr.msk.f32.vlgmr.msra.gmra.mrb[18].mxu0 %vm37_vm1, %v4920_v57  ;;  %4365 = vmatmul.mubr.msk.f32.vlgmr.msra.gmra.mrb[30].mxu1 %vm37_vm1, %v4920_v57 }
 0x9cb   :  { %2623 = vmatpush1.msra.mxu0 %v4682_v10  ;;  %2686 = vmatprep.mubr.f32.mxu0 %v4642_v1 }
 0x9cc   :  { %4368 = vmatpush3.msra.mxu1 %v4687_v13  ;;  %4369 = vmatprep.mubr.msk.f32.mxu1 %vm4643_vm0, %v4642_v1 }
 0x9cd   :  { %2763 = vmatprep.subr.mxu0 %v4685_v12  ;;  %4372 = vmatprep.subr.mxu1 %v4642_v1 }
 0xa9d   :  { %v2518_v56 = vpop.f32.mrb[18].mxu0  ;;  %v2589_v58 = vpop.f32.mrb[30].mxu1 }
 0xa9e   :  { %v2594_v59 = vadd.f32 %v2518_v56, %v4742_v51  ;;  %v2520_v60 = vpop.f32.mrb[19].mxu0  ;;  %v4366_v61 = vpop.f32.mrb[31].mxu1  ;;  %v2609_v19 = vadd.f32 %v2589_v58, %v4750_v3 }
 0xa9f   :  { %v2602_v63 = vadd.f32 %v2520_v60, %v4745_v55 }
 0xaa0   :  { %v4202_v62 = vmul.f32 -1.442695, %v2594_v59 }
 0xaa1   :  { %v4203_v2 = vmul.f32 -1.442695, %v2602_v63 }
 0xaa2   :  { %4530 = vpow2.f32 %v4202_v62 }
 0xaa3   :  { %4532 = vpow2.f32 %v4203_v2 }
 0xaac   :  { %v4531_v4 = vpop.eup %4530 }
 0xaad   :  { %v2598_v5 = vadd.f32 1.0, %v4531_v4  ;;  %v4533_v7 = vpop.eup %4532 }
 0xaae   :  { %v2606_v8 = vadd.f32 1.0, %v4533_v7 }
 0xaaf   :  { %4534 = vrcp.f32 %v2598_v5 }
 0xab0   :  { %4536 = vrcp.f32 %v2606_v8 }
 0xab9   :  { %v4535_v11 = vpop.eup %4534 }
 0xaba   :  { %v2611_v20 = vmul.f32 %v4535_v11, %v2610_v9  ;;  %v4537_v22 = vpop.eup %4536  ;;  %v5001_v9 = vld [vmem:[#allocation4 + $0x38] sm:$0xff]  ;;  %v5009_v11 = vld [vmem:[#allocation4 + $0x30] sm:$0xff] }
 0xabb   :  { %v2614_v25 = vsub.f32 1.0, %v4537_v22  ;;  %v2616_v26 = vmul.f32 %v4537_v22, %v4892_v28 }
 0xabc   :  { %v2612_v21 = vadd.f32 %v2611_v20, %v2609_v19  ;;  %v5013_v19 = vld [vmem:[#allocation4 + $0x40] sm:$0xff]  ;;  %v4605_v20 = vld [vmem:[#allocation4 + $0x50] sm:$0xff] }
 0xabe   :  { %4538 = vtanh.f32 %v2612_v21 }
 0xac8   :  { %v4539_v23 = vpop.eup %4538 }
 0xac9   :  { %v2615_v24 = vmul.f32 %v4539_v23, %v2614_v25  ;;  %v3389_v25 = vld [vmem:[#allocation2 + $0x6] ss:$8 sm:$0x7] }
 0xacb   :  { %v4938_v29 = vadd.f32 %v2616_v26, %v2615_v24 }
 0xacd   :  { %2618 = vst.msk [vmem:[#allocation3 + $0x4] sm:$0x1] %vm681_vm3, %v4938_v29  ;;  %4204 = vmatmul.mubr.msk.f32.vlgmr.msra.gmra.mrb[22].mxu0 %vm37_vm1, %v4938_v29  ;;  %4370 = vmatmul.mubr.msk.f32.vlgmr.msra.gmra.mrb[32].mxu1 %vm37_vm1, %v4938_v29 }
 0xace   :  { %2764 = vmatpush1.msra.mxu0 %v4694_v14  ;;  %2827 = vmatprep.mubr.f32.mxu0 %v4642_v1 }
 0xacf   :  { %4373 = vmatpush3.msra.mxu1 %v4700_v15  ;;  %4374 = vmatprep.mubr.msk.f32.mxu1 %vm4643_vm0, %v4642_v1 }
 0xad0   :  { %2936 = vmatprep.subr.mxu0 %v4715_v16  ;;  %4377 = vmatprep.subr.mxu1 %v4642_v1  ;;  %v2905_v16 = vld [vmem:[#allocation2 + $0x5] ss:$8 sm:$0x7] }
 0xad1   :  { %4206 = vmatmul.mubr.msk.f32.vlgmr.msra.gmra.mrb[24].mxu0 %vm37_vm1, %v4920_v57  ;;  %4375 = vmatmul.mubr.msk.f32.vlgmr.msra.gmra.mrb[34].mxu1 %vm37_vm1, %v4920_v57  ;;  %v2925_v41 = vrot.slane %v2905_v16, 2 }
 0xad2   :  { %2937 = vmatpush1.msra.mxu0 %v4717_v17  ;;  %3000 = vmatprep.mubr.f32.mxu0 %v4642_v1  ;;  %v2914_v17 = vrot.slane %v2905_v16, 1 }
 0xad3   :  { %4378 = vmatpush3.msra.mxu1 %v4719_v18  ;;  %4379 = vmatprep.mubr.msk.f32.mxu1 %vm4643_vm0, %v4642_v1 }
 0xad4   :  { %3106 = vmatprep.subr.mxu0 %v4678_v6  ;;  %4382 = vmatprep.subr.mxu1 %v4642_v1 }
 0xba0   :  { %v2759_v14 = vpop.f32.mrb[32].mxu1 }
 0xba1   :  { %v4371_v15 = vpop.f32.mrb[33].mxu1 }
 0xba2   :  { %v3398_v15 = vrot.slane %v3389_v25, 1 }
 0xba4   :  { %v2829_v28 = vpop.f32.mrb[24].mxu0  ;;  %v2900_v27 = vpop.f32.mrb[34].mxu1 }
 0xba5   :  { %v2906_v30 = vadd.f32 %v2905_v16, %v2829_v28  ;;  %v2831_v31 = vpop.f32.mrb[25].mxu0  ;;  %v4376_v32 = vpop.f32.mrb[35].mxu1  ;;  %v2923_v39 = vadd.f32 %v2900_v27, %v4726_v38 }
 0xba6   :  { %v2916_v34 = vadd.f32 %v2914_v17, %v2831_v31 }
 0xba7   :  { %v4208_v33 = vmul.f32 -1.442695, %v2906_v30 }
 0xba8   :  { %v4209_v18 = vmul.f32 -1.442695, %v2916_v34 }
 0xba9   :  { %4540 = vpow2.f32 %v4208_v33  ;;  %v5019_v33 = vld [vmem:[#allocation4 + $0x60] ss:$0 sm:$0xff] }
 0xbaa   :  { %4542 = vpow2.f32 %v4209_v18 }
 0xbb3   :  { %v4541_v35 = vpop.eup %4540 }
 0xbb4   :  { %v2910_v36 = vadd.f32 1.0, %v4541_v35  ;;  %v4543_v6 = vpop.eup %4542  ;;  %v3409_v35 = vrot.slane %v3389_v25, 2 }
 0xbb5   :  { %v2920_v37 = vadd.f32 1.0, %v4543_v6 }
 0xbb6   :  { %4544 = vrcp.f32 %v2910_v36 }
 0xbb7   :  { %4546 = vrcp.f32 %v2920_v37 }
 0xbc0   :  { %v4545_v40 = vpop.eup %4544 }
 0xbc1   :  { %v2924_v42 = vmul.f32 %v4545_v40, %v2923_v39  ;;  %v4547_v44 = vpop.eup %4546 }
 0xbc2   :  { %v2929_v45 = vsub.f32 1.0, %v4547_v44  ;;  %v2931_v48 = vmul.f32 %v4547_v44, %v4920_v57  ;;  %v4607_v44 = vld [vmem:[#allocation4 + $0x48] sm:$0xff] }
 0xbc3   :  { %v2927_v43 = vadd.f32 %v2925_v41, %v2924_v42 }
 0xbc5   :  { %4548 = vtanh.f32 %v2927_v43 }
 0xbcf   :  { %v4549_v46 = vpop.eup %4548 }
 0xbd0   :  { %v2930_v47 = vmul.f32 %v4549_v46, %v2929_v45  ;;  %v4608_v45 = vld [vmem:[#allocation4 + $0x58] sm:$0xff]  ;;  %v4609_v46 = vld [vmem:[#allocation4 + $0x20] sm:$0xff] }
 0xbd2   :  { %v4966_v49 = vadd.f32 %v2931_v48, %v2930_v47 }
 0xbd4   :  { %4210 = vmatmul.mubr.msk.f32.vlgmr.msra.gmra.mrb[22].mxu0 %vm37_vm1, %v4966_v49  ;;  %4380 = vmatmul.mubr.msk.f32.vlgmr.msra.gmra.mrb[36].mxu1 %vm37_vm1, %v4966_v49 }
 0xbd5   :  { %3107 = vmatpush1.msra.mxu0 %v4682_v10  ;;  %3170 = vmatprep.mubr.f32.mxu0 %v4642_v1 }
 0xbd6   :  { %4383 = vmatpush3.msra.mxu1 %v4687_v13  ;;  %4384 = vmatprep.mubr.msk.f32.mxu1 %vm4643_vm0, %v4642_v1 }
 0xbd7   :  { %3247 = vmatprep.subr.mxu0 %v4685_v12  ;;  %4387 = vmatprep.subr.mxu1 %v4642_v1  ;;  %v3094_v12 = vadd.f32 %v2759_v14, %v4748_v0  ;;  %v4992_v0 = vld [vmem:[#allocation4 + $0x18] sm:$0xff] }
 0xca7   :  { %v3002_v38 = vpop.f32.mrb[22].mxu0  ;;  %v3073_v52 = vpop.f32.mrb[36].mxu1 }
 0xca8   :  { %v3078_v50 = vadd.f32 %v3002_v38, %v4742_v51  ;;  %v3004_v53 = vpop.f32.mrb[23].mxu0  ;;  %v4381_v54 = vpop.f32.mrb[37].mxu1  ;;  %v3093_v62 = vadd.f32 %v3073_v52, %v4750_v3  ;;  %v4996_v3 = vld [vmem:[#allocation4 + $0x28] sm:$0xff] }
 0xca9   :  { %v3086_v10 = vadd.f32 %v3004_v53, %v4745_v55  ;;  %v5036_v54 = vld [vmem:[#allocation4 + $0x62] ss:$0 sm:$0xff] }
 0xcaa   :  { %v4212_v57 = vmul.f32 -1.442695, %v3078_v50 }
 0xcab   :  { %v4213_v56 = vmul.f32 -1.442695, %v3086_v10 }
 0xcac   :  { %4550 = vpow2.f32 %v4212_v57 }
 0xcad   :  { %4552 = vpow2.f32 %v4213_v56 }
 0xcb6   :  { %v4551_v13 = vpop.eup %4550 }
 0xcb7   :  { %v3082_v58 = vadd.f32 1.0, %v4551_v13  ;;  %v4553_v59 = vpop.eup %4552 }
 0xcb8   :  { %v3090_v60 = vadd.f32 1.0, %v4553_v59 }
 0xcb9   :  { %4554 = vrcp.f32 %v3082_v58 }
 0xcba   :  { %4556 = vrcp.f32 %v3090_v60  ;;  %v5039_v60 = vld [vmem:[#allocation4 + $0x64] ss:$0 sm:$0xff] }
 0xcc3   :  { %v4555_v61 = vpop.eup %4554 }
 0xcc4   :  { %v3095_v63 = vmul.f32 %v4555_v61, %v3094_v12  ;;  %v4557_v2 = vpop.eup %4556 }
 0xcc5   :  { %v3098_v4 = vsub.f32 1.0, %v4557_v2  ;;  %v3100_v7 = vmul.f32 %v4557_v2, %v4938_v29 }
 0xcc6   :  { %v3096_v51 = vadd.f32 %v3095_v63, %v3093_v62  ;;  %v5042_v62 = vld [vmem:[#allocation4 + $0x63] ss:$0 sm:$0xff] }
 0xcc8   :  { %4558 = vtanh.f32 %v3096_v51 }
 0xcd2   :  { %v4559_v55 = vpop.eup %4558 }
 0xcd3   :  { %v3099_v5 = vmul.f32 %v4559_v55, %v3098_v4 }
 0xcd5   :  { %v4984_v8 = vadd.f32 %v3100_v7, %v3099_v5 }
 0xcd7   :  { %3102 = vst.msk [vmem:[#allocation3 + $0x5] sm:$0x1] %vm681_vm3, %v4984_v8  ;;  %4214 = vmatmul.mubr.msk.f32.vlgmr.msra.gmra.mrb[26].mxu0 %vm37_vm1, %v4984_v8  ;;  %4385 = vmatmul.mubr.msk.f32.vlgmr.msra.gmra.mrb[38].mxu1 %vm37_vm1, %v4984_v8 }
 0xcd8   :  { %3248 = vmatpush1.msra.mxu0 %v4992_v0  ;;  %3311 = vmatprep.mubr.f32.mxu0 %v4642_v1 }
 0xcd9   :  { %4388 = vmatpush3.msra.mxu1 %v4996_v3  ;;  %4389 = vmatprep.mubr.msk.f32.mxu1 %vm4643_vm0, %v4642_v1 }
 0xcda   :  { %3420 = vmatprep.subr.mxu0 %v5001_v9  ;;  %4392 = vmatprep.subr.mxu1 %v4642_v1 }
 0xcdb   :  { %4216 = vmatmul.mubr.msk.f32.vlgmr.msra.gmra.mrb[28].mxu0 %vm37_vm1, %v4966_v49  ;;  %4390 = vmatmul.mubr.msk.f32.vlgmr.msra.gmra.mrb[40].mxu1 %vm37_vm1, %v4966_v49 }
 0xcdc   :  { %3421 = vmatpush1.msra.mxu0 %v5009_v11  ;;  %3484 = vmatprep.mubr.f32.mxu0 %v4642_v1 }
 0xcdd   :  { %4393 = vmatpush3.msra.mxu1 %v5013_v19  ;;  %4394 = vmatprep.mubr.msk.f32.mxu1 %vm4643_vm0, %v4642_v1 }
 0xcde   :  { %3590 = vmatprep.subr.mxu0 %v4605_v20  ;;  %4397 = vmatprep.subr.mxu1 %v4642_v1 }
 0xdaa   :  { %v3243_v21 = vpop.f32.mrb[38].mxu1 }
 0xdab   :  { %v4386_v22 = vpop.f32.mrb[39].mxu1  ;;  %v3578_v12 = vadd.f32 %v5039_v60, %v3243_v21 }
 0xdae   :  { %v3313_v23 = vpop.f32.mrb[28].mxu0  ;;  %v3384_v24 = vpop.f32.mrb[40].mxu1 }
 0xdaf   :  { %v3390_v26 = vadd.f32 %v3389_v25, %v3313_v23  ;;  %v3315_v29 = vpop.f32.mrb[29].mxu0  ;;  %v4391_v14 = vpop.f32.mrb[41].mxu1  ;;  %v3407_v34 = vadd.f32 %v5019_v33, %v3384_v24 }
 0xdb0   :  { %v3400_v28 = vadd.f32 %v3398_v15, %v3315_v29 }
 0xdb1   :  { %v4218_v16 = vmul.f32 -1.442695, %v3390_v26 }
 0xdb2   :  { %v4219_v27 = vmul.f32 -1.442695, %v3400_v28 }
 0xdb3   :  { %4560 = vpow2.f32 %v4218_v16 }
 0xdb4   :  { %4562 = vpow2.f32 %v4219_v27 }
 0xdbd   :  { %v4561_v30 = vpop.eup %4560 }
 0xdbe   :  { %v3394_v31 = vadd.f32 1.0, %v4561_v30  ;;  %v4563_v32 = vpop.eup %4562 }
 0xdbf   :  { %v3404_v17 = vadd.f32 1.0, %v4563_v32 }
 0xdc0   :  { %4564 = vrcp.f32 %v3394_v31 }
 0xdc1   :  { %4566 = vrcp.f32 %v3404_v17 }
 0xdca   :  { %v4565_v18 = vpop.eup %4564 }
 0xdcb   :  { %v3408_v36 = vmul.f32 %v4565_v18, %v3407_v34  ;;  %v4567_v37 = vpop.eup %4566 }
 0xdcc   :  { %v3413_v39 = vsub.f32 1.0, %v4567_v37  ;;  %v3415_v42 = vmul.f32 %v4567_v37, %v4966_v49  ;;  %v5033_v49 = vld [vmem:[#allocation4 + $0x61] ss:$0 sm:$0xff] }
 0xdcd   :  { %v3411_v6 = vadd.f32 %v3409_v35, %v3408_v36 }
 0xdcf   :  { %4568 = vtanh.f32 %v3411_v6 }
 0xdd9   :  { %v4569_v40 = vpop.eup %4568 }
 0xdda   :  { %v3414_v41 = vmul.f32 %v4569_v40, %v3413_v39 }
 0xddc   :  { %v5023_v43 = vadd.f32 %v3415_v42, %v3414_v41 }
 0xdde   :  { %4220 = vmatmul.mubr.msk.f32.vlgmr.msra.gmra.mrb[26].mxu0 %vm37_vm1, %v5023_v43  ;;  %4395 = vmatmul.mubr.msk.f32.vlgmr.msra.gmra.mrb[42].mxu1 %vm37_vm1, %v5023_v43 }
 0xddf   :  { %3591 = vmatpush1.msra.mxu0 %v4607_v44  ;;  %3654 = vmatprep.mubr.f32.mxu0 %v4642_v1 }
 0xde0   :  { %4398 = vmatpush3.msra.mxu1 %v4608_v45  ;;  %4399 = vmatprep.mubr.msk.f32.mxu1 %vm4643_vm0, %v4642_v1 }
 0xde1   :  { %3731 = vmatprep.subr.mxu0 %v4609_v46  ;;  %4402 = vmatprep.subr.mxu1 %v4642_v1 }
 0xeb1   :  { %v3486_v47 = vpop.f32.mrb[26].mxu0  ;;  %v3557_v48 = vpop.f32.mrb[42].mxu1 }
 0xeb2   :  { %v3562_v38 = vadd.f32 %v5033_v49, %v3486_v47  ;;  %v3488_v52 = vpop.f32.mrb[27].mxu0  ;;  %v4396_v50 = vpop.f32.mrb[43].mxu1  ;;  %v3577_v63 = vadd.f32 %v5042_v62, %v3557_v48 }
 0xeb3   :  { %v3570_v57 = vadd.f32 %v5036_v54, %v3488_v52 }
 0xeb4   :  { %v4222_v53 = vmul.f32 -1.442695, %v3562_v38 }
 0xeb5   :  { %v4223_v10 = vmul.f32 -1.442695, %v3570_v57 }
 0xeb6   :  { %4570 = vpow2.f32 %v4222_v53 }
 0xeb7   :  { %4572 = vpow2.f32 %v4223_v10 }
 0xec0   :  { %v4571_v56 = vpop.eup %4570 }
 0xec1   :  { %v3566_v13 = vadd.f32 1.0, %v4571_v56  ;;  %v4573_v58 = vpop.eup %4572 }
 0xec2   :  { %v3574_v59 = vadd.f32 1.0, %v4573_v58 }
 0xec3   :  { %4574 = vrcp.f32 %v3566_v13 }
 0xec4   :  { %4576 = vrcp.f32 %v3574_v59 }
 0xecd   :  { %v4575_v61 = vpop.eup %4574 }
 0xece   :  { %v3579_v51 = vmul.f32 %v4575_v61, %v3578_v12  ;;  %v4577_v4 = vpop.eup %4576 }
 0xecf   :  { %v3582_v55 = vsub.f32 1.0, %v4577_v4  ;;  %v3584_v20 = vmul.f32 %v4577_v4, %v4984_v8 }
 0xed0   :  { %v3580_v2 = vadd.f32 %v3579_v51, %v3577_v63 }
 0xed2   :  { %4578 = vtanh.f32 %v3580_v2 }
 0xedc   :  { %v4579_v5 = vpop.eup %4578 }
 0xedd   :  { %v3583_v7 = vmul.f32 %v4579_v5, %v3582_v55 }
 0xedf   :  { %v5046_v22 = vadd.f32 %v3584_v20, %v3583_v7 }
 0xee1   :  { %3586 = vst.msk [vmem:[#allocation3 + $0x6] sm:$0x1] %vm681_vm3, %v5046_v22  ;;  %4224 = vmatmul.mubr.msk.f32.vlgmr.msra.gmra.mrb[30].mxu0 %vm37_vm1, %v5046_v22  ;;  %4400 = vmatmul.mubr.msk.f32.vlgmr.msra.gmra.mrb[44].mxu1 %vm37_vm1, %v5046_v22 }
 0xee2   :  { %3732 = vmatpush1.msra.mxu0 %v4992_v0  ;;  %3795 = vmatprep.mubr.f32.mxu0 %v4642_v1 }
 0xee3   :  { %4403 = vmatpush3.msra.mxu1 %v4996_v3  ;;  %4404 = vmatprep.mubr.msk.f32.mxu1 %vm4643_vm0, %v4642_v1  ;;  %v3873_v3 = vld [vmem:[#allocation2 + $0x7] ss:$8 sm:$0x7] }
 0xee4   :  { %3904 = vmatprep.subr.mxu0 %v5001_v9  ;;  %4407 = vmatprep.subr.mxu1 %v4642_v1  ;;  %v3882_v26 = vrot.slane %v3873_v3, 1  ;;  %v3893_v31 = vrot.slane %v3873_v3, 2 }
 0xee5   :  { %4226 = vmatmul.mubr.msk.f32.vlgmr.msra.gmra.mrb[32].mxu0 %vm37_vm1, %v5023_v43  ;;  %4405 = vmatmul.mubr.msk.f32.vlgmr.msra.gmra.mrb[46].mxu1 %vm37_vm1, %v5023_v43 }
 0xee6   :  { %3905 = vmatpush1.msra.mxu0 %v5009_v11  ;;  %3968 = vmatprep.mubr.f32.mxu0 %v4642_v1 }
 0xee7   :  { %4408 = vmatpush3.msra.mxu1 %v5013_v19  ;;  %4409 = vmatprep.mubr.msk.f32.mxu1 %vm4643_vm0, %v4642_v1 }
 0xee8   :  { %4412 = vmatprep.subr.mxu0 %v4642_v1 }
 0xfb4   :  { %v3727_v8 = vpop.f32.mrb[44].mxu1 }
 0xfb5   :  { %v4401_v0 = vpop.f32.mrb[45].mxu1 }
 0xfb8   :  { %v3797_v9 = vpop.f32.mrb[32].mxu0  ;;  %v3868_v21 = vpop.f32.mrb[46].mxu1 }
 0xfb9   :  { %v3874_v25 = vadd.f32 %v3873_v3, %v3797_v9  ;;  %v3799_v23 = vpop.f32.mrb[33].mxu0  ;;  %v4406_v24 = vpop.f32.mrb[47].mxu1  ;;  %v3891_v27 = vadd.f32 %v5019_v33, %v3868_v21  ;;  %v4071_v33 = vld [vmem:[#allocation4 + $0x78] sm:$0xff] }
 0xfba   :  { %v3884_v11 = vadd.f32 %v3882_v26, %v3799_v23 }
 0xfbb   :  { %v4228_v29 = vmul.f32 -1.442695, %v3874_v25 }
 0xfbc   :  { %v4229_v14 = vmul.f32 -1.442695, %v3884_v11 }
 0xfbd   :  { %4580 = vpow2.f32 %v4228_v29 }
 0xfbe   :  { %4582 = vpow2.f32 %v4229_v14 }
 0xfc7   :  { %v4581_v19 = vpop.eup %4580 }
 0xfc8   :  { %v3878_v15 = vadd.f32 1.0, %v4581_v19  ;;  %v4583_v16 = vpop.eup %4582 }
 0xfc9   :  { %v3888_v28 = vadd.f32 1.0, %v4583_v16 }
 0xfca   :  { %4584 = vrcp.f32 %v3878_v15 }
 0xfcb   :  { %4586 = vrcp.f32 %v3888_v28 }
 0xfd4   :  { %v4585_v30 = vpop.eup %4584 }
 0xfd5   :  { %v3892_v32 = vmul.f32 %v4585_v30, %v3891_v27  ;;  %v4587_v34 = vpop.eup %4586 }
 0xfd6   :  { %v3897_v18 = vsub.f32 1.0, %v4587_v34  ;;  %v3899_v6 = vmul.f32 %v4587_v34, %v5023_v43 }
 0xfd7   :  { %v3895_v17 = vadd.f32 %v3893_v31, %v3892_v32 }
 0xfd9   :  { %4588 = vtanh.f32 %v3895_v17 }
 0xfe3   :  { %v4589_v35 = vpop.eup %4588 }
 0xfe4   :  { %v3898_v36 = vmul.f32 %v4589_v35, %v3897_v18 }
 0xfe6   :  { %v3900_v37 = vadd.f32 %v3899_v6, %v3898_v36 }
 0xfe8   :  { %4230 = vmatmul.mubr.msk.f32.vlgmr.msra.gmra.mrb[30].mxu0 %vm37_vm1, %v3900_v37  ;;  %4410 = vmatmul.mubr.msk.f32.vlgmr.msra.gmra.mrb[48].mxu1 %vm37_vm1, %v3900_v37 }
 0xfe9   :  { %4414 = vmatprep.mubr.msk.f32.mxu0 %vm4643_vm0, %v4642_v1  ;;  %4413 = vmatpush3.msra.mxu0 %v4071_v33  ;;  %v4062_v1 = vadd.f32 %v5039_v60, %v3727_v8  ;;  %v4072_v60 = vld [vmem:[#allocation4 + $0x65] ss:$0 sm:$0xff] }
0x10bb   :  { %v3970_v39 = vpop.f32.mrb[30].mxu0  ;;  %v4041_v40 = vpop.f32.mrb[48].mxu1 }
0x10bc   :  { %v4046_v41 = vadd.f32 %v5033_v49, %v3970_v39  ;;  %v3972_v42 = vpop.f32.mrb[31].mxu0  ;;  %v4411_v44 = vpop.f32.mrb[49].mxu1  ;;  %v4061_v53 = vadd.f32 %v5042_v62, %v4041_v40 }
0x10bd   :  { %v4054_v46 = vadd.f32 %v5036_v54, %v3972_v42 }
0x10be   :  { %v4232_v45 = vmul.f32 -1.442695, %v4046_v41 }
0x10bf   :  { %v4233_v43 = vmul.f32 -1.442695, %v4054_v46 }
0x10c0   :  { %4590 = vpow2.f32 %v4232_v45 }
0x10c1   :  { %4592 = vpow2.f32 %v4233_v43 }
0x10ca   :  { %v4591_v47 = vpop.eup %4590 }
0x10cb   :  { %v4050_v48 = vadd.f32 1.0, %v4591_v47  ;;  %v4593_v38 = vpop.eup %4592 }
0x10cc   :  { %v4058_v52 = vadd.f32 1.0, %v4593_v38 }
0x10cd   :  { %4594 = vrcp.f32 %v4050_v48 }
0x10ce   :  { %4596 = vrcp.f32 %v4058_v52 }
0x10d7   :  { %v4595_v50 = vpop.eup %4594 }
0x10d8   :  { %v4063_v57 = vmul.f32 %v4595_v50, %v4062_v1  ;;  %v4597_v10 = vpop.eup %4596 }
0x10d9   :  { %v4066_v56 = vsub.f32 1.0, %v4597_v10  ;;  %v4068_v58 = vmul.f32 %v4597_v10, %v5046_v22 }
0x10da   :  { %v4064_v49 = vadd.f32 %v4063_v57, %v4061_v53 }
0x10dc   :  { %4598 = vtanh.f32 %v4064_v49 }
0x10e6   :  { %v4599_v54 = vpop.eup %4598 }
0x10e7   :  { %v4067_v13 = vmul.f32 %v4599_v54, %v4066_v56 }
0x10e9   :  { %v4069_v59 = vadd.f32 %v4068_v58, %v4067_v13 }
0x10eb   :  { %4070 = vst.msk [vmem:[#allocation3 + $0x7] sm:$0x1] %vm681_vm3, %v4069_v59 }
0x10f2   :  { %v4073_v12 = vld [vmem:[#allocation3] sm:$0xff] }
0x10f3   :  { %4415 = vmatmul.mubr.msk.f32.vlgmr.msra.gmra.mrb[34].mxu0 %vm37_vm1, %v4073_v12 }
0x11c6   :  { %v4143_v61 = vpop.f32.mrb[34].mxu0 }
0x11c7   :  { %v4144_v63 = vadd.f32 %v4143_v61, %v4072_v60  ;;  %v4416_v62 = vpop.f32.mrb[35].mxu0 }
0x11c9   :  { %v4147_v51 = vmax.f32 %v4144_v63, 0.0 }
0x11cb   :  { %4149 = vst.msk [vmem:[%s5089_s2] sm:$0xff] %vm4148_vm4, %v4147_v51 }
0x11cc   :  { %4154 = vsyncpa [#allocation5], 1 }

</bundles_post_ra>
